<compile_context>
chip_gen: v7x
topology: tpu7x:2x2x1
jax: 0.10.0
libtpu: 0.0.40
codegen_flags: <defaults>
</compile_context>

<pallas_src>
import jax
import jax.numpy as jnp
from jax import lax
from jax.experimental import pallas as pl
from jax.experimental.pallas import tpu as pltpu

MXU_DTYPE = jnp.bfloat16          # MXU operand / big-intermediate dtype
BN_EPS = 1e-5
LRELU_SLOPE = 0.2                 # the module uses F.leaky_relu(..., 0.2)


# ----------------------------------------------------------------------------
# Sizing helpers (generation-aware VMEM budget + lane-tile derivation).
# ----------------------------------------------------------------------------
def _round_up(x, m):
    return (x + m - 1) // m * m


def _vmem_limit_bytes():
    """Scoped-VMEM limit: ~3/4 of physical VMEM, capped at 96 MiB.
    v5e/v6e (128 MiB) -> 96 MiB;  v7x (64 MiB) -> 48 MiB;  fallback 48 MiB."""
    cap = 64 * 1024 * 1024
    try:
        info = pltpu.get_tpu_info()
        v = int(getattr(info, "vmem_capacity_bytes", 0))
        if v > 0:
            cap = v
    except Exception:
        pass
    return min(int(cap * 3 // 4), 96 * 1024 * 1024)


def _pick_tile(m, k, cout, vmem_limit, cap=2048):
    """Largest lane tile (multiple of 128, <= cap) whose double-buffered
    pass-1/pass-2 working set fits ~half the scoped-VMEM budget."""
    budget = vmem_limit // 2
    tm = max(128, (min(cap, _round_up(m, 128)) // 128) * 128)

    def usage(t):
        return (2 * k * t * 2            # patch block (bf16, double buffered)
                + 2 * cout * t * 2       # y block (bf16, double buffered)
                + 2 * cout * t * 4       # pass-2 f32 output block (worst case)
                + 2 * cout * max(k, 8) * 2   # weights (double buffered)
                + 64 * 1024)             # bias / stats / semaphores / misc

    while tm > 128 and usage(tm) > budget:
        tm -= 128
    return tm


# ----------------------------------------------------------------------------
# XLA glue (exact PyTorch semantics): bilinear upsample + im2col, channel-first.
# ----------------------------------------------------------------------------
def upsample_bilinear_cnhw(x, scale, out_dtype=MXU_DTYPE):
    """x: (C, N, H, W). Matches F.interpolate(mode='bilinear',
    align_corners=False) with integer scale_factor. Math in f32, output cast."""
    c, n, h, w = x.shape
    ho, wo = h * scale, w * scale
    xf = x.astype(jnp.float32)

    def src(out_size, in_size):
        d = jnp.arange(out_size, dtype=jnp.float32)
        s = (d + 0.5) * (in_size / out_size) - 0.5
        s = jnp.maximum(s, 0.0)
        i0 = jnp.minimum(jnp.floor(s).astype(jnp.int32), in_size - 1)
        i1 = jnp.minimum(i0 + 1, in_size - 1)
        w1 = s - i0.astype(jnp.float32)
        return i0, i1, 1.0 - w1, w1

    hi0, hi1, hw0, hw1 = src(ho, h)
    wi0, wi1, ww0, ww1 = src(wo, w)

    x_h0 = xf[:, :, hi0]                     # (C, N, Ho, W)
    x_h1 = xf[:, :, hi1]
    x00 = x_h0[:, :, :, wi0]                 # (C, N, Ho, Wo)
    x01 = x_h0[:, :, :, wi1]
    x10 = x_h1[:, :, :, wi0]
    x11 = x_h1[:, :, :, wi1]

    hw0 = hw0[None, None, :, None]
    hw1 = hw1[None, None, :, None]
    ww0 = ww0[None, None, None, :]
    ww1 = ww1[None, None, None, :]
    out = (x00 * hw0 * ww0 + x01 * hw0 * ww1 +
           x10 * hw1 * ww0 + x11 * hw1 * ww1)
    return out.astype(out_dtype)


def im2col_cnhw(x, stride):
    """x: (C, N, H, W), 3x3 kernel, padding 1. Returns patches (9*C, N*Ho*Wo)
    with K ordered (kh, kw, c) and M ordered (n, ho, wo), plus (n, ho, wo).
    Keeps the input dtype (bf16) so the 9x-expanded tensor stays half-width."""
    c, n, h, w = x.shape
    xp = jnp.pad(x, ((0, 0), (0, 0), (1, 1), (1, 1)))
    ho = (h + 2 - 3) // stride + 1
    wo = (w + 2 - 3) // stride + 1
    taps = []
    for kh in range(3):
        for kw in range(3):
            taps.append(xp[:, :, kh:kh + stride * (ho - 1) + 1:stride,
                               kw:kw + stride * (wo - 1) + 1:stride])
    patches = jnp.stack(taps, axis=0)        # (9, C, N, Ho, Wo)
    return patches.reshape(9 * c, n * ho * wo), (n, ho, wo)


def weight_to_cm(w):
    """Torch conv weight (Cout, Cin, 3, 3) -> (Cout, 9*Cin), (kh, kw, cin) order."""
    cout, cin = w.shape[0], w.shape[1]
    return jnp.transpose(w, (0, 2, 3, 1)).reshape(cout, 9 * cin).astype(MXU_DTYPE)


# ----------------------------------------------------------------------------
# Pass 1: conv (transposed, lane-dense) + bias + per-tile sum / sumsq stats.
# Grid = (branch, M-tile), both "parallel" (no cross-tile scratch dependency).
# ----------------------------------------------------------------------------
def _conv_stats_kernel(w_ref, p_ref, b_ref, y_ref, st_ref):
    # (Cout, K) @ (K, TM) on the MXU, f32 accumulation.
    acc = jnp.dot(w_ref[0], p_ref[0], preferred_element_type=jnp.float32)
    # Store y = conv + bias in bf16 (halves the HBM round trip to pass 2).
    y_ref[...] = (acc + b_ref[0])[None].astype(y_ref.dtype)
    # Per-tile stats of the PRE-BIAS conv output: zero-padded M columns
    # contribute exactly zero, and the mean shift is re-applied in fold_bn.
    s1 = jnp.sum(acc, axis=1, keepdims=True)
    s2 = jnp.sum(acc * acc, axis=1, keepdims=True)
    st_ref[...] = jnp.concatenate([s1, s2], axis=1)[None, None]


def conv_bias_stats(patches, w_cm, bias, tm, vmem_limit):
    """patches: (B, K, M) bf16, w_cm: (B, Cout, K) bf16, bias: (B, Cout, 1) f32.
    Returns y (B, Cout, Mp) bf16 and stats (B, Cout, 2) f32 = [sum, sumsq] of
    the pre-bias conv output over the true M columns."""
    nb, k, m = patches.shape
    cout = w_cm.shape[1]
    m_pad = _round_up(m, tm)
    if m_pad != m:
        patches = jnp.pad(patches, ((0, 0), (0, 0), (0, m_pad - m)))
    n_tiles = m_pad // tm

    y, st = pl.pallas_call(
        _conv_stats_kernel,
        out_shape=(jax.ShapeDtypeStruct((nb, cout, m_pad), MXU_DTYPE),
                   jax.ShapeDtypeStruct((nb, n_tiles, cout, 2), jnp.float32)),
        grid_spec=pltpu.PrefetchScalarGridSpec(
            num_scalar_prefetch=0,
            grid=(nb, n_tiles),
            in_specs=[pl.BlockSpec((1, cout, k), lambda b, i: (b, 0, 0)),
                      pl.BlockSpec((1, k, tm), lambda b, i: (b, 0, i)),
                      pl.BlockSpec((1, cout, 1), lambda b, i: (b, 0, 0))],
            out_specs=[pl.BlockSpec((1, cout, tm), lambda b, i: (b, 0, i)),
                       pl.BlockSpec((1, 1, cout, 2), lambda b, i: (b, i, 0, 0))]),
        compiler_params=pltpu.CompilerParams(
            dimension_semantics=("parallel", "parallel"),
            vmem_limit_bytes=vmem_limit),
    )(w_cm.astype(MXU_DTYPE), patches.astype(MXU_DTYPE),
      bias.astype(jnp.float32))
    stats = jnp.sum(st, axis=1)               # tree-reduce per-tile partials, f32
    return y, stats


# ----------------------------------------------------------------------------
# Pass 2: folded BN (y*a + c) + LeakyReLU(0.2); fused variant adds the
# shortcut branch.  Lane-dense, "parallel" over M tiles, bf16 loads / f32 math.
# ----------------------------------------------------------------------------
def _bn_lrelu_kernel(y_ref, s_ref, o_ref):
    s = s_ref[...]                                         # (C, 2) f32
    z = y_ref[0].astype(jnp.float32) * s[:, 0:1] + s[:, 1:2]
    o_ref[...] = jnp.where(z > 0, z, LRELU_SLOPE * z).astype(o_ref.dtype)


def bn_lrelu(y, scale_shift, tm, vmem_limit, out_dtype=MXU_DTYPE):
    """y: (1, Cout, Mp) bf16; scale_shift: (Cout, 2) f32 -> (Cout, Mp)."""
    _, cout, mp = y.shape
    assert mp % tm == 0
    return pl.pallas_call(
        _bn_lrelu_kernel,
        out_shape=jax.ShapeDtypeStruct((cout, mp), out_dtype),
        grid_spec=pltpu.PrefetchScalarGridSpec(
            num_scalar_prefetch=0,
            grid=(mp // tm,),
            in_specs=[pl.BlockSpec((1, cout, tm), lambda i: (0, 0, i)),
                      pl.BlockSpec((cout, 2), lambda i: (0, 0))],
            out_specs=pl.BlockSpec((cout, tm), lambda i: (0, i))),
        compiler_params=pltpu.CompilerParams(
            dimension_semantics=("parallel",),
            vmem_limit_bytes=vmem_limit),
    )(y, scale_shift)


def _bn_lrelu_add_kernel(y_ref, s_ref, o_ref):
    s = s_ref[...]                                         # (C, 4) f32
    z2 = y_ref[0].astype(jnp.float32) * s[:, 0:1] + s[:, 1:2]
    z2 = jnp.where(z2 > 0, z2, LRELU_SLOPE * z2)
    zs = y_ref[1].astype(jnp.float32) * s[:, 2:3] + s[:, 3:4]
    zs = jnp.where(zs > 0, zs, LRELU_SLOPE * zs)
    o_ref[...] = z2 + zs


def bn_lrelu_add(y_all, scales, tm, vmem_limit):
    """y_all: (2, Cout, Mp) bf16 (branch 0 = conv2 path, branch 1 = shortcut);
    scales: (Cout, 4) f32 = [a2, c2, a_sc, c_sc].  Output (Cout, Mp) f32."""
    _, cout, mp = y_all.shape
    assert mp % tm == 0
    return pl.pallas_call(
        _bn_lrelu_add_kernel,
        out_shape=jax.ShapeDtypeStruct((cout, mp), jnp.float32),
        grid_spec=pltpu.PrefetchScalarGridSpec(
            num_scalar_prefetch=0,
            grid=(mp // tm,),
            in_specs=[pl.BlockSpec((2, cout, tm), lambda i: (0, 0, i)),
                      pl.BlockSpec((cout, 4), lambda i: (0, 0))],
            out_specs=pl.BlockSpec((cout, tm), lambda i: (0, i))),
        compiler_params=pltpu.CompilerParams(
            dimension_semantics=("parallel",),
            vmem_limit_bytes=vmem_limit),
    )(y_all, scales)


def fold_bn(stats, bias, gamma, beta, m):
    """stats = [sum, sumsq] of the pre-bias conv output over the true m columns.
    Training-mode BatchNorm (biased batch variance) folded into bn(y)=y*a+c."""
    s1 = stats[:, 0] / m
    s2 = stats[:, 1] / m
    mean = s1 + bias                               # mean(conv + bias)
    var = jnp.maximum(s2 - s1 * s1, 0.0)           # shift-invariant variance
    a = gamma * lax.rsqrt(var + BN_EPS)
    c = beta - mean * a
    return a, c


# ----------------------------------------------------------------------------
# ResBlock_Up forward
# ----------------------------------------------------------------------------
def init_params(key, input_size, out_layers):
    ks = jax.random.split(key, 8)
    scale = 0.1

    def conv_params(kw, kb, cin, cout):
        w = scale * jax.random.normal(kw, (cout, cin, 3, 3), jnp.float32)
        b = scale * jax.random.normal(kb, (cout,), jnp.float32)
        return w, b

    w1, b1 = conv_params(ks[0], ks[1], input_size, input_size)
    w2, b2 = conv_params(ks[2], ks[3], input_size, out_layers)
    ws, bs = conv_params(ks[4], ks[5], input_size, out_layers)
    g1 = 1.0 + 0.05 * jax.random.normal(ks[6], (input_size,), jnp.float32)
    be1 = 0.05 * jax.random.normal(ks[7], (input_size,), jnp.float32)
    g2 = 1.0 + 0.05 * jnp.cos(jnp.arange(out_layers, dtype=jnp.float32))
    be2 = 0.05 * jnp.sin(jnp.arange(out_layers, dtype=jnp.float32))
    gs = 1.0 - 0.05 * jnp.sin(jnp.arange(out_layers, dtype=jnp.float32))
    bes = 0.05 * jnp.cos(jnp.arange(out_layers, dtype=jnp.float32))
    return dict(w1=w1, b1=b1, g1=g1, be1=be1,
                w2=w2, b2=b2, g2=g2, be2=be2,
                ws=ws, bs=bs, gs=gs, bes=bes)


def resblock_up_forward(params, x_nchw):
    """x_nchw: (N, C_in, H, W) f32 -> (N, C_out, 2H, 2W) f32."""
    n, cin, h, w = x_nchw.shape
    cout = params["w2"].shape[0]
    vmem_limit = _vmem_limit_bytes()

    x = jnp.transpose(x_nchw, (1, 0, 2, 3))                       # (Cin, N, H, W)

    # ---- branch path stage 1: Upsample(x2) -> Conv(3x3,s=2) -> BN -> LReLU ---
    u1 = upsample_bilinear_cnhw(x, 2)                             # bf16
    p1, (_, h1, w1) = im2col_cnhw(u1, 2)                          # (9Cin, N*H*W)
    k1, m1 = p1.shape
    tm1 = _pick_tile(m1, k1, cin, vmem_limit)
    y1, st1 = conv_bias_stats(p1[None], weight_to_cm(params["w1"])[None],
                              params["b1"].reshape(1, cin, 1), tm1, vmem_limit)
    a1, c1 = fold_bn(st1[0], params["b1"], params["g1"], params["be1"], m1)
    out1 = bn_lrelu(y1, jnp.stack([a1, c1], axis=1), tm1, vmem_limit)
    out1 = out1[:, :m1].reshape(cin, n, h1, w1)                   # bf16

    # ---- conv2 patches (Upsample(out1, x2), stride 1) and shortcut patches ---
    u2 = upsample_bilinear_cnhw(out1, 2)                          # (Cin,N,2H,2W)
    p2, (_, h2, w2) = im2col_cnhw(u2, 1)                          # (9Cin, N*2H*2W)
    us = upsample_bilinear_cnhw(x, 4)                             # (Cin,N,4H,4W)
    ps, _ = im2col_cnhw(us, 2)                                    # (9Cin, N*2H*2W)
    k2, m2 = p2.shape
    assert ps.shape == (k2, m2)
    tm2 = _pick_tile(m2, k2, cout, vmem_limit)

    # ---- fused pass 1: both output-resolution convs in one launch ------------
    patches2 = jnp.stack([p2, ps], axis=0)                        # (2, K, M) bf16
    w_all = jnp.stack([weight_to_cm(params["w2"]),
                       weight_to_cm(params["ws"])], axis=0)       # (2, Cout, K)
    b_all = jnp.stack([params["b2"], params["bs"]], axis=0).reshape(2, cout, 1)
    y_all, st_all = conv_bias_stats(patches2, w_all, b_all, tm2, vmem_limit)

    a2, c2 = fold_bn(st_all[0], params["b2"], params["g2"], params["be2"], m2)
    asc, csc = fold_bn(st_all[1], params["bs"], params["gs"], params["bes"], m2)

    # ---- fused pass 2: BN + LeakyReLU on both branches + residual add --------
    out = bn_lrelu_add(y_all, jnp.stack([a2, c2, asc, csc], axis=1),
                       tm2, vmem_limit)
    out = out[:, :m2].reshape(cout, n, h2, w2)
    return jnp.transpose(out, (1, 0, 2, 3))                       # NCHW f32


if __name__ == "__main__":
    key = jax.random.PRNGKey(0)
    k_x, k_p = jax.random.split(key)

    N, C_in, H, W = 2, 4, 16, 16
    C_out = 8
    x = jax.random.normal(k_x, (N, C_in, H, W), jnp.float32)
    params = init_params(k_p, C_in, C_out)

    fwd = jax.jit(resblock_up_forward)
    y = fwd(params, x)
    y = jax.block_until_ready(y)

    assert y.shape == (N, C_out, 2 * H, 2 * W), y.shape
    assert y.dtype == jnp.float32
    assert bool(jnp.all(jnp.isfinite(y)))
    print("KERNEL_OK")
</pallas_src>

<mosaic_0001>
module attributes {stable_mosaic.version = 11 : i64} {
  func.func @_conv_stats_kernel(%arg0: i32, %arg1: i32, %arg2: memref<1x4x36xbf16, #tpu.memory_space<vmem>>, %arg3: memref<1x36x512xbf16, #tpu.memory_space<vmem>>, %arg4: memref<1x4x1xf32, #tpu.memory_space<vmem>>, %arg5: memref<1x4x512xbf16, #tpu.memory_space<vmem>>, %arg6: memref<1x1x4x2xf32, #tpu.memory_space<vmem>>) attributes {dimension_semantics = [#tpu.dimension_semantics<parallel>, #tpu.dimension_semantics<parallel>], iteration_bounds = array<i64: 1, 1>, scalar_prefetch = 0 : i64, scratch_operands = 0 : i64, tpu.core_type = #tpu.core_type<tc>, window_params = [{transform_indices = @transform_0, window_bounds = array<i64: 1, 4, 36>}, {transform_indices = @transform_1, window_bounds = array<i64: 1, 36, 512>}, {transform_indices = @transform_2, window_bounds = array<i64: 1, 4, 1>}, {transform_indices = @transform_3, window_bounds = array<i64: 1, 4, 512>}, {transform_indices = @transform_4, window_bounds = array<i64: 1, 1, 4, 2>}]} {
    %c0 = arith.constant 0 : index
    %c0_0 = arith.constant 0 : index
    %c0_1 = arith.constant 0 : index
    %0 = vector.load %arg2[%c0, %c0_0, %c0_1] : memref<1x4x36xbf16, #tpu.memory_space<vmem>>, vector<1x4x36xbf16>
    %1 = vector.shape_cast %0 : vector<1x4x36xbf16> to vector<4x36xbf16>
    %c0_2 = arith.constant 0 : index
    %c0_3 = arith.constant 0 : index
    %c0_4 = arith.constant 0 : index
    %2 = vector.load %arg3[%c0_2, %c0_3, %c0_4] : memref<1x36x512xbf16, #tpu.memory_space<vmem>>, vector<1x36x512xbf16>
    %3 = vector.shape_cast %2 : vector<1x36x512xbf16> to vector<36x512xbf16>
    %cst = arith.constant dense<0.000000e+00> : vector<4x512xf32>
    %4 = tpu.matmul %1, %3, %cst {dimension_numbers = #tpu.dot_dimension_numbers<[1], [0], [0], [1], [0, 0, 1, 1], [], []>} : vector<4x36xbf16>, vector<36x512xbf16>, vector<4x512xf32> -> vector<4x512xf32>
    %c0_5 = arith.constant 0 : index
    %c0_6 = arith.constant 0 : index
    %c0_7 = arith.constant 0 : index
    %5 = vector.load %arg4[%c0_5, %c0_6, %c0_7] : memref<1x4x1xf32, #tpu.memory_space<vmem>>, vector<1x4x1xf32>
    %6 = vector.shape_cast %5 : vector<1x4x1xf32> to vector<4x1xf32>
    %7 = vector.broadcast %6 : vector<4x1xf32> to vector<4x512xf32>
    %8 = arith.addf %4, %7 : vector<4x512xf32>
    %9 = vector.shape_cast %8 : vector<4x512xf32> to vector<1x4x512xf32>
    %10 = arith.truncf %9 : vector<1x4x512xf32> to vector<1x4x512xbf16>
    %c0_8 = arith.constant 0 : index
    %c0_9 = arith.constant 0 : index
    %c0_10 = arith.constant 0 : index
    %11 = vector.load %arg5[%c0_8, %c0_9, %c0_10] : memref<1x4x512xbf16, #tpu.memory_space<vmem>>, vector<1x4x512xbf16>
    tpu.vector_store %arg5[%c0_8, %c0_9, %c0_10], %10 {strides = array<i32>} : memref<1x4x512xbf16, #tpu.memory_space<vmem>>, vector<1x4x512xbf16>,
    %cst_11 = arith.constant dense<0.000000e+00> : vector<4xf32>
    %12 = vector.multi_reduction <add>, %4, %cst_11 [1] : vector<4x512xf32> to vector<4xf32>
    %13 = vector.shape_cast %12 : vector<4xf32> to vector<4x1xf32>
    %14 = arith.mulf %4, %4 : vector<4x512xf32>
    %cst_12 = arith.constant dense<0.000000e+00> : vector<4xf32>
    %15 = vector.multi_reduction <add>, %14, %cst_12 [1] : vector<4x512xf32> to vector<4xf32>
    %16 = vector.shape_cast %15 : vector<4xf32> to vector<4x1xf32>
    %17 = tpu.concatenate %13, %16 in 1 : vector<4x1xf32>, vector<4x1xf32> -> vector<4x2xf32>
    %18 = vector.shape_cast %17 : vector<4x2xf32> to vector<1x1x4x2xf32>
    %c0_13 = arith.constant 0 : index
    %c0_14 = arith.constant 0 : index
    %c0_15 = arith.constant 0 : index
    %c0_16 = arith.constant 0 : index
    %19 = vector.load %arg6[%c0_13, %c0_14, %c0_15, %c0_16] : memref<1x1x4x2xf32, #tpu.memory_space<vmem>>, vector<1x1x4x2xf32>
    tpu.vector_store %arg6[%c0_13, %c0_14, %c0_15, %c0_16], %18 {strides = array<i32>} : memref<1x1x4x2xf32, #tpu.memory_space<vmem>>, vector<1x1x4x2xf32>,
    return
  }
  func.func @transform_0(%arg0: i32, %arg1: i32) -> (i32, i32, i32) {
    %c0_i32 = arith.constant 0 : i32
    %c0_i32_0 = arith.constant 0 : i32
    %c0_i32_1 = arith.constant 0 : i32
    return %arg0, %c0_i32, %c0_i32_0 : i32, i32, i32
  }
  func.func @transform_1(%arg0: i32, %arg1: i32) -> (i32, i32, i32) {
    %c0_i32 = arith.constant 0 : i32
    %c0_i32_0 = arith.constant 0 : i32
    return %arg0, %c0_i32, %arg1 : i32, i32, i32
  }
  func.func @transform_2(%arg0: i32, %arg1: i32) -> (i32, i32, i32) {
    %c0_i32 = arith.constant 0 : i32
    %c0_i32_0 = arith.constant 0 : i32
    %c0_i32_1 = arith.constant 0 : i32
    return %arg0, %c0_i32, %c0_i32_0 : i32, i32, i32
  }
  func.func @transform_3(%arg0: i32, %arg1: i32) -> (i32, i32, i32) {
    %c0_i32 = arith.constant 0 : i32
    %c0_i32_0 = arith.constant 0 : i32
    return %arg0, %c0_i32, %arg1 : i32, i32, i32
  }
  func.func @transform_4(%arg0: i32, %arg1: i32) -> (i32, i32, i32, i32) {
    %c0_i32 = arith.constant 0 : i32
    %c0_i32_0 = arith.constant 0 : i32
    %c0_i32_1 = arith.constant 0 : i32
    return %arg0, %arg1, %c0_i32, %c0_i32_0 : i32, i32, i32, i32
  }
}

module attributes {stable_mosaic.version = 11 : i64} {
  func.func @_bn_lrelu_kernel(%arg0: i32, %arg1: memref<1x4x512xbf16, #tpu.memory_space<vmem>>, %arg2: memref<4x2xf32, #tpu.memory_space<vmem>>, %arg3: memref<4x512xbf16, #tpu.memory_space<vmem>>) attributes {dimension_semantics = [#tpu.dimension_semantics<parallel>], iteration_bounds = array<i64: 1>, scalar_prefetch = 0 : i64, scratch_operands = 0 : i64, tpu.core_type = #tpu.core_type<tc>, window_params = [{transform_indices = @transform_0, window_bounds = array<i64: 1, 4, 512>}, {pipeline_mode = #tpu.pipeline_mode<synchronous>, transform_indices = @transform_1, window_bounds = array<i64: 4, 2>}, {transform_indices = @transform_2, window_bounds = array<i64: 4, 512>}]} {
    %c0 = arith.constant 0 : index
    %c0_0 = arith.constant 0 : index
    %0 = vector.load %arg2[%c0, %c0_0] : memref<4x2xf32, #tpu.memory_space<vmem>>, vector<4x2xf32>
    %c0_1 = arith.constant 0 : index
    %c0_2 = arith.constant 0 : index
    %c0_3 = arith.constant 0 : index
    %1 = vector.load %arg1[%c0_1, %c0_2, %c0_3] : memref<1x4x512xbf16, #tpu.memory_space<vmem>>, vector<1x4x512xbf16>
    %2 = vector.shape_cast %1 : vector<1x4x512xbf16> to vector<4x512xbf16>
    %3 = arith.extf %2 : vector<4x512xbf16> to vector<4x512xf32>
    %4 = vector.extract_strided_slice %0 {offsets = [0, 0], sizes = [4, 1], strides = [1, 1]} : vector<4x2xf32> to vector<4x1xf32>
    %5 = vector.broadcast %4 : vector<4x1xf32> to vector<4x512xf32>
    %6 = arith.mulf %3, %5 : vector<4x512xf32>
    %7 = vector.extract_strided_slice %0 {offsets = [0, 1], sizes = [4, 1], strides = [1, 1]} : vector<4x2xf32> to vector<4x1xf32>
    %8 = vector.broadcast %7 : vector<4x1xf32> to vector<4x512xf32>
    %9 = arith.addf %6, %8 : vector<4x512xf32>
    %cst = arith.constant 0.000000e+00 : f32
    %10 = vector.broadcast %cst : f32 to vector<4x512xf32>
    %11 = arith.cmpf ogt, %9, %10 : vector<4x512xf32>
    %cst_4 = arith.constant 2.000000e-01 : f32
    %12 = vector.broadcast %cst_4 : f32 to vector<4x512xf32>
    %13 = arith.mulf %12, %9 : vector<4x512xf32>
    %14 = arith.select %11, %9, %13 : vector<4x512xi1>, vector<4x512xf32>
    %15 = arith.truncf %14 : vector<4x512xf32> to vector<4x512xbf16>
    %c0_5 = arith.constant 0 : index
    %c0_6 = arith.constant 0 : index
    %16 = vector.load %arg3[%c0_5, %c0_6] : memref<4x512xbf16, #tpu.memory_space<vmem>>, vector<4x512xbf16>
    tpu.vector_store %arg3[%c0_5, %c0_6], %15 {strides = array<i32>} : memref<4x512xbf16, #tpu.memory_space<vmem>>, vector<4x512xbf16>,
    return
  }
  func.func @transform_0(%arg0: i32) -> (i32, i32, i32) {
    %c0_i32 = arith.constant 0 : i32
    %c0_i32_0 = arith.constant 0 : i32
    %c0_i32_1 = arith.constant 0 : i32
    return %c0_i32, %c0_i32_0, %arg0 : i32, i32, i32
  }
  func.func @transform_1(%arg0: i32) -> (i32, i32) {
    %c0_i32 = arith.constant 0 : i32
    %c0_i32_0 = arith.constant 0 : i32
    %c0_i32_1 = arith.constant 0 : i32
    return %c0_i32, %c0_i32_0 : i32, i32
  }
  func.func @transform_2(%arg0: i32) -> (i32, i32) {
    %c0_i32 = arith.constant 0 : i32
    %c0_i32_0 = arith.constant 0 : i32
    return %c0_i32, %arg0 : i32, i32
  }
}

module attributes {stable_mosaic.version = 11 : i64} {
  func.func @_conv_stats_kernel(%arg0: i32, %arg1: i32, %arg2: memref<1x8x36xbf16, #tpu.memory_space<vmem>>, %arg3: memref<1x36x2048xbf16, #tpu.memory_space<vmem>>, %arg4: memref<1x8x1xf32, #tpu.memory_space<vmem>>, %arg5: memref<1x8x2048xbf16, #tpu.memory_space<vmem>>, %arg6: memref<1x1x8x2xf32, #tpu.memory_space<vmem>>) attributes {dimension_semantics = [#tpu.dimension_semantics<parallel>, #tpu.dimension_semantics<parallel>], iteration_bounds = array<i64: 2, 1>, scalar_prefetch = 0 : i64, scratch_operands = 0 : i64, tpu.core_type = #tpu.core_type<tc>, window_params = [{transform_indices = @transform_0, window_bounds = array<i64: 1, 8, 36>}, {transform_indices = @transform_1, window_bounds = array<i64: 1, 36, 2048>}, {transform_indices = @transform_2, window_bounds = array<i64: 1, 8, 1>}, {transform_indices = @transform_3, window_bounds = array<i64: 1, 8, 2048>}, {transform_indices = @transform_4, window_bounds = array<i64: 1, 1, 8, 2>}]} {
    %c0 = arith.constant 0 : index
    %c0_0 = arith.constant 0 : index
    %c0_1 = arith.constant 0 : index
    %0 = vector.load %arg2[%c0, %c0_0, %c0_1] : memref<1x8x36xbf16, #tpu.memory_space<vmem>>, vector<1x8x36xbf16>
    %1 = vector.shape_cast %0 : vector<1x8x36xbf16> to vector<8x36xbf16>
    %c0_2 = arith.constant 0 : index
    %c0_3 = arith.constant 0 : index
    %c0_4 = arith.constant 0 : index
    %2 = vector.load %arg3[%c0_2, %c0_3, %c0_4] : memref<1x36x2048xbf16, #tpu.memory_space<vmem>>, vector<1x36x2048xbf16>
    %3 = vector.shape_cast %2 : vector<1x36x2048xbf16> to vector<36x2048xbf16>
    %cst = arith.constant dense<0.000000e+00> : vector<8x2048xf32>
    %4 = tpu.matmul %1, %3, %cst {dimension_numbers = #tpu.dot_dimension_numbers<[1], [0], [0], [1], [0, 0, 1, 1], [], []>} : vector<8x36xbf16>, vector<36x2048xbf16>, vector<8x2048xf32> -> vector<8x2048xf32>
    %c0_5 = arith.constant 0 : index
    %c0_6 = arith.constant 0 : index
    %c0_7 = arith.constant 0 : index
    %5 = vector.load %arg4[%c0_5, %c0_6, %c0_7] : memref<1x8x1xf32, #tpu.memory_space<vmem>>, vector<1x8x1xf32>
    %6 = vector.shape_cast %5 : vector<1x8x1xf32> to vector<8x1xf32>
    %7 = vector.broadcast %6 : vector<8x1xf32> to vector<8x2048xf32>
    %8 = arith.addf %4, %7 : vector<8x2048xf32>
    %9 = vector.shape_cast %8 : vector<8x2048xf32> to vector<1x8x2048xf32>
    %10 = arith.truncf %9 : vector<1x8x2048xf32> to vector<1x8x2048xbf16>
    %c0_8 = arith.constant 0 : index
    %c0_9 = arith.constant 0 : index
    %c0_10 = arith.constant 0 : index
    %11 = vector.load %arg5[%c0_8, %c0_9, %c0_10] : memref<1x8x2048xbf16, #tpu.memory_space<vmem>>, vector<1x8x2048xbf16>
    tpu.vector_store %arg5[%c0_8, %c0_9, %c0_10], %10 {strides = array<i32>} : memref<1x8x2048xbf16, #tpu.memory_space<vmem>>, vector<1x8x2048xbf16>,
    %cst_11 = arith.constant dense<0.000000e+00> : vector<8xf32>
    %12 = vector.multi_reduction <add>, %4, %cst_11 [1] : vector<8x2048xf32> to vector<8xf32>
    %13 = vector.shape_cast %12 : vector<8xf32> to vector<8x1xf32>
    %14 = arith.mulf %4, %4 : vector<8x2048xf32>
    %cst_12 = arith.constant dense<0.000000e+00> : vector<8xf32>
    %15 = vector.multi_reduction <add>, %14, %cst_12 [1] : vector<8x2048xf32> to vector<8xf32>
    %16 = vector.shape_cast %15 : vector<8xf32> to vector<8x1xf32>
    %17 = tpu.concatenate %13, %16 in 1 : vector<8x1xf32>, vector<8x1xf32> -> vector<8x2xf32>
    %18 = vector.shape_cast %17 : vector<8x2xf32> to vector<1x1x8x2xf32>
    %c0_13 = arith.constant 0 : index
    %c0_14 = arith.constant 0 : index
    %c0_15 = arith.constant 0 : index
    %c0_16 = arith.constant 0 : index
    %19 = vector.load %arg6[%c0_13, %c0_14, %c0_15, %c0_16] : memref<1x1x8x2xf32, #tpu.memory_space<vmem>>, vector<1x1x8x2xf32>
    tpu.vector_store %arg6[%c0_13, %c0_14, %c0_15, %c0_16], %18 {strides = array<i32>} : memref<1x1x8x2xf32, #tpu.memory_space<vmem>>, vector<1x1x8x2xf32>,
    return
  }
  func.func @transform_0(%arg0: i32, %arg1: i32) -> (i32, i32, i32) {
    %c0_i32 = arith.constant 0 : i32
    %c0_i32_0 = arith.constant 0 : i32
    %c0_i32_1 = arith.constant 0 : i32
    return %arg0, %c0_i32, %c0_i32_0 : i32, i32, i32
  }
  func.func @transform_1(%arg0: i32, %arg1: i32) -> (i32, i32, i32) {
    %c0_i32 = arith.constant 0 : i32
    %c0_i32_0 = arith.constant 0 : i32
    return %arg0, %c0_i32, %arg1 : i32, i32, i32
  }
  func.func @transform_2(%arg0: i32, %arg1: i32) -> (i32, i32, i32) {
    %c0_i32 = arith.constant 0 : i32
    %c0_i32_0 = arith.constant 0 : i32
    %c0_i32_1 = arith.constant 0 : i32
    return %arg0, %c0_i32, %c0_i32_0 : i32, i32, i32
  }
  func.func @transform_3(%arg0: i32, %arg1: i32) -> (i32, i32, i32) {
    %c0_i32 = arith.constant 0 : i32
    %c0_i32_0 = arith.constant 0 : i32
    return %arg0, %c0_i32, %arg1 : i32, i32, i32
  }
  func.func @transform_4(%arg0: i32, %arg1: i32) -> (i32, i32, i32, i32) {
    %c0_i32 = arith.constant 0 : i32
    %c0_i32_0 = arith.constant 0 : i32
    %c0_i32_1 = arith.constant 0 : i32
    return %arg0, %arg1, %c0_i32, %c0_i32_0 : i32, i32, i32, i32
  }
}

module attributes {stable_mosaic.version = 11 : i64} {
  func.func @_bn_lrelu_add_kernel(%arg0: i32, %arg1: memref<2x8x2048xbf16, #tpu.memory_space<vmem>>, %arg2: memref<8x4xf32, #tpu.memory_space<vmem>>, %arg3: memref<8x2048xf32, #tpu.memory_space<vmem>>) attributes {dimension_semantics = [#tpu.dimension_semantics<parallel>], iteration_bounds = array<i64: 1>, scalar_prefetch = 0 : i64, scratch_operands = 0 : i64, tpu.core_type = #tpu.core_type<tc>, window_params = [{transform_indices = @transform_0, window_bounds = array<i64: 2, 8, 2048>}, {pipeline_mode = #tpu.pipeline_mode<synchronous>, transform_indices = @transform_1, window_bounds = array<i64: 8, 4>}, {transform_indices = @transform_2, window_bounds = array<i64: 8, 2048>}]} {
    %c0 = arith.constant 0 : index
    %c0_0 = arith.constant 0 : index
    %0 = vector.load %arg2[%c0, %c0_0] : memref<8x4xf32, #tpu.memory_space<vmem>>, vector<8x4xf32>
    %c0_1 = arith.constant 0 : index
    %c0_2 = arith.constant 0 : index
    %c0_3 = arith.constant 0 : index
    %1 = vector.load %arg1[%c0_1, %c0_2, %c0_3] : memref<2x8x2048xbf16, #tpu.memory_space<vmem>>, vector<1x8x2048xbf16>
    %2 = vector.shape_cast %1 : vector<1x8x2048xbf16> to vector<8x2048xbf16>
    %3 = arith.extf %2 : vector<8x2048xbf16> to vector<8x2048xf32>
    %4 = vector.extract_strided_slice %0 {offsets = [0, 0], sizes = [8, 1], strides = [1, 1]} : vector<8x4xf32> to vector<8x1xf32>
    %5 = vector.broadcast %4 : vector<8x1xf32> to vector<8x2048xf32>
    %6 = arith.mulf %3, %5 : vector<8x2048xf32>
    %7 = vector.extract_strided_slice %0 {offsets = [0, 1], sizes = [8, 1], strides = [1, 1]} : vector<8x4xf32> to vector<8x1xf32>
    %8 = vector.broadcast %7 : vector<8x1xf32> to vector<8x2048xf32>
    %9 = arith.addf %6, %8 : vector<8x2048xf32>
    %cst = arith.constant 0.000000e+00 : f32
    %10 = vector.broadcast %cst : f32 to vector<8x2048xf32>
    %11 = arith.cmpf ogt, %9, %10 : vector<8x2048xf32>
    %cst_4 = arith.constant 2.000000e-01 : f32
    %12 = vector.broadcast %cst_4 : f32 to vector<8x2048xf32>
    %13 = arith.mulf %12, %9 : vector<8x2048xf32>
    %14 = arith.select %11, %9, %13 : vector<8x2048xi1>, vector<8x2048xf32>
    %c1 = arith.constant 1 : index
    %c0_5 = arith.constant 0 : index
    %c0_6 = arith.constant 0 : index
    %15 = vector.load %arg1[%c1, %c0_5, %c0_6] : memref<2x8x2048xbf16, #tpu.memory_space<vmem>>, vector<1x8x2048xbf16>
    %16 = vector.shape_cast %15 : vector<1x8x2048xbf16> to vector<8x2048xbf16>
    %17 = arith.extf %16 : vector<8x2048xbf16> to vector<8x2048xf32>
    %18 = vector.extract_strided_slice %0 {offsets = [0, 2], sizes = [8, 1], strides = [1, 1]} : vector<8x4xf32> to vector<8x1xf32>
    %19 = vector.broadcast %18 : vector<8x1xf32> to vector<8x2048xf32>
    %20 = arith.mulf %17, %19 : vector<8x2048xf32>
    %21 = vector.extract_strided_slice %0 {offsets = [0, 3], sizes = [8, 1], strides = [1, 1]} : vector<8x4xf32> to vector<8x1xf32>
    %22 = vector.broadcast %21 : vector<8x1xf32> to vector<8x2048xf32>
    %23 = arith.addf %20, %22 : vector<8x2048xf32>
    %cst_7 = arith.constant 0.000000e+00 : f32
    %24 = vector.broadcast %cst_7 : f32 to vector<8x2048xf32>
    %25 = arith.cmpf ogt, %23, %24 : vector<8x2048xf32>
    %cst_8 = arith.constant 2.000000e-01 : f32
    %26 = vector.broadcast %cst_8 : f32 to vector<8x2048xf32>
    %27 = arith.mulf %26, %23 : vector<8x2048xf32>
    %28 = arith.select %25, %23, %27 : vector<8x2048xi1>, vector<8x2048xf32>
    %29 = arith.addf %14, %28 : vector<8x2048xf32>
    %c0_9 = arith.constant 0 : index
    %c0_10 = arith.constant 0 : index
    %30 = vector.load %arg3[%c0_9, %c0_10] : memref<8x2048xf32, #tpu.memory_space<vmem>>, vector<8x2048xf32>
    tpu.vector_store %arg3[%c0_9, %c0_10], %29 {strides = array<i32>} : memref<8x2048xf32, #tpu.memory_space<vmem>>, vector<8x2048xf32>,
    return
  }
  func.func @transform_0(%arg0: i32) -> (i32, i32, i32) {
    %c0_i32 = arith.constant 0 : i32
    %c0_i32_0 = arith.constant 0 : i32
    %c0_i32_1 = arith.constant 0 : i32
    return %c0_i32, %c0_i32_0, %arg0 : i32, i32, i32
  }
  func.func @transform_1(%arg0: i32) -> (i32, i32) {
    %c0_i32 = arith.constant 0 : i32
    %c0_i32_0 = arith.constant 0 : i32
    %c0_i32_1 = arith.constant 0 : i32
    return %c0_i32, %c0_i32_0 : i32, i32
  }
  func.func @transform_2(%arg0: i32) -> (i32, i32) {
    %c0_i32 = arith.constant 0 : i32
    %c0_i32_0 = arith.constant 0 : i32
    return %c0_i32, %arg0 : i32, i32
  }
}

</mosaic_0001>

<bundles_post_ra>
// kernel: resblock_up_forward.5
= control target key start
LH: loop header
LB: loop body
LE: loop exit
PB: predicated region body
PF: predicated region fallthrough
CT: control target
= control target key end

     0   :  { %v93_v0 = vmov 0   ;;  %v94_v2 = vmov 1   ;;  %v95_v3 = vmov 839922192   ;;  %v22_v5 = vlaneseq  ;;  %s121_s1 = inlined_call_operand.vmem [shape: f32[4,2], index: 1, kind: input, shape index: {}]   ;;  %s122_s0 = inlined_call_operand.vmem [shape: bf16[1,4,512], index: 0, kind: input, shape index: {}]   ;;  %s123_s2 = inlined_call_operand.vmem [shape: bf16[4,512], index: 2, kind: output, shape index: {}]  }
   0x1   :  { %91 = vset.pattern.permute.xlu0 %v93_v0  ;;  %v11_v1 = vld [vmem:[%s121_s1] sm:$0xf]  ;;  %v20_v4 = vunpack.c.l.s4 %v95_v3  ;;  %v96_v14 = vmov 1983009808  }
   0x2   :  { %17 = vperm.xlu0 %91, %v11_v1   ;;  %v23_v7 = vshrl.u32 %v22_v5, 7  ;;  %v12_v9 = vld [vmem:[%s122_s0] sm:$0xff]  ;;  %v65_v15 = vunpack.c.l.s4 %v96_v14 }
   0x3   :  { %v21_v6 = vunpack.c.0.s8 %v20_v4  ;;  %v13_v11 = vunpack.c.l.bf16 %v12_v9  ;;  %v14_v12 = vunpack.c.h.bf16 %v12_v9 }
   0x4   :  { %v66_v22 = vunpack.c.0.s8 %v65_v15 }
   0x5   :  { %v24_v8 = vsub.s32 %v21_v6, %v23_v7 }
   0x6   :  { %92 = vset.pattern.permute.xlu0 %v94_v2  ;;  %v69_v27 = vsub.s32 %v66_v22, %v23_v7 }
   0x7   :  { %30 = vperm.xlu0 %92, %v11_v1  }
  0x81   :  { %v18_v10 = vpop.permute.xlu0 %17 }
  0x82   :  { %v25_v13 = vrot.slane %v18_v10, %v24_v8 }
  0x84   :  { %v27_v17 = vmul.f32 %v25_v13, %v13_v11  ;;  %v28_v18 = vmul.f32 %v25_v13, %v14_v12 }
  0x86   :  { %v31_v16 = vpop.permute.xlu0 %30 }
  0x87   :  { %v38_v19 = vrot.slane %v31_v16, %v24_v8 }
  0x89   :  { %v40_v20 = vadd.f32 %v38_v19, %v27_v17  ;;  %v41_v21 = vadd.f32 %v38_v19, %v28_v18 }
  0x8b   :  { %vm42_vm0 = vcmp.gt.f32.partialorder %v40_v20, 0.0  ;;  %vm43_vm1 = vcmp.gt.f32.partialorder %v41_v21, 0.0  ;;  %v44_v23 = vmul.f32 0.2, %v40_v20  ;;  %v45_v24 = vmul.f32 0.2, %v41_v21 }
  0x8d   :  { %v46_v25 = vsel %vm42_vm0, %v40_v20, %v44_v23  ;;  %v47_v26 = vsel %vm43_vm1, %v41_v21, %v45_v24 }
  0x8e   :  { %v50_v28 = vcombine.high %v46_v25, %v46_v25  ;;  %v51_v29 = vcombine.high %v47_v26, %v47_v26 }
  0x90   :  { %v85_v30 = vpack.c.bf16 %v50_v28, %v46_v25  ;;  %v86_v31 = vpack.c.bf16 %v51_v29, %v47_v26 }
  0x92   :  { %v70_v32 = vrot.slane %v85_v30, %v69_v27  ;;  %v77_v33 = vrot.slane %v86_v31, %v69_v27 }
  0x94   :  { %v78_v34 = vcombine.low %v70_v32, %v77_v33 }
  0x96   :  { %80 = vst [vmem:[%s123_s2] sm:$0xff] %v78_v34 }

// kernel: resblock_up_forward.4
= control target key start
LH: loop header
LB: loop body
LE: loop exit
PB: predicated region body
PF: predicated region fallthrough
CT: control target
= control target key end

     0   :  { %v286_v1 = vmov 0   ;;  %vm82_vm0 = vcmask 1041408   ;;  %vm78_vm1 = vcmask 293888   ;;  %v287_v19 = vmov 1983009808   ;;  %s367_s1 = inlined_call_operand.vmem [shape: bf16[1,36,512], index: 1, kind: input, shape index: {}]   ;;  %s368_s2 = inlined_call_operand.vmem [shape: f32[1,4,1], index: 2, kind: input, shape index: {}]   ;;  %s369_s0 = inlined_call_operand.vmem [shape: bf16[1,4,36], index: 0, kind: input, shape index: {}]   ;;  %s370_s3 = inlined_call_operand.vmem [shape: bf16[1,4,512], index: 3, kind: output, shape index: {0}]   ;;  %s371_s4 = inlined_call_operand.vmem [shape: f32[1,1,4,2], index: 4, kind: output, shape index: {1}]  }
   0x1   :  { %v270_v0 = vld [vmem:[%s367_s1 + $0x4] ss:$16 sps:$4 sm:$0xff]   ;;  %127 = vmatprep.mubr.bf16.mxu0 %v286_v1  ;;  %168 = vmatprep.mubr.bf16.mxu1 %v286_v1  ;;  %v272_v2 = vld [vmem:[%s367_s1 + $0xc] ss:$16 sps:$4 sm:$0xff]   ;;  %v274_v3 = vld [vmem:[%s367_s1] ss:$16 sps:$4 sm:$0xff]   ;;  %v198_v20 = vunpack.c.l.s4 %v287_v19  ;;  %v200_v21 = vlaneseq }
   0x2   :  { %269 = vset.pattern.permute.xlu0 %v286_v1  ;;  %95 = vmatprep.subr.bf16.mxu0 %v270_v0  ;;  %v275_v4 = vld [vmem:[%s367_s1 + $0x8] ss:$16 sps:$4 sm:$0xff]   ;;  %v276_v5 = vld [vmem:[%s367_s1 + $0x24] ss:$16 sps:$4 sm:$0xff]   ;;  %v278_v6 = vld [vmem:[%s367_s1 + $0x2c] ss:$16 sps:$4 sm:$0xff]  }
   0x3   :  { %136 = vmatprep.subr.bf16.mxu1 %v272_v2  ;;  %96 = vmatpush1.bf16.msra.mxu0 %v274_v3  ;;  %v280_v7 = vld [vmem:[%s367_s1 + $0x20] ss:$16 sps:$4 sm:$0xff]   ;;  %v281_v8 = vld [vmem:[%s367_s1 + $0x28] ss:$16 sps:$4 sm:$0xff]   ;;  %v199_v22 = vunpack.c.0.s8 %v198_v20  ;;  %v201_v23 = vshrl.u32 %v200_v21, 7  ;;  %vm214_vm2 = vcmask 1043456  }
   0x4   :  { %137 = vmatpush1.bf16.msra.mxu1 %v275_v4  ;;  %97 = vmatprep.subr.bf16.mxu0 %v276_v5  ;;  %v26_v9 = vld [vmem:[%s367_s1 + $0x40] sm:$0x33]  ;;  %v27_v10 = vld [vmem:[%s367_s1 + $0x48] sm:$0x33]  ;;  %vm237_vm3 = vcmask 7168   ;;  %vm239_vm4 = vcmask 11264  }
   0x5   :  { %138 = vmatprep.subr.bf16.mxu1 %v278_v6  ;;  %v258_v11 = vcombine.high %v26_v9, %v26_v9  ;;  %v260_v12 = vcombine.high %v27_v10, %v27_v10  ;;  %v257_v13 = vcombine.low %v26_v9, %v26_v9  ;;  %v259_v14 = vcombine.low %v27_v10, %v27_v10  ;;  %v177_v15 = vld [vmem:[%s368_s2] sm:$0xf] }
   0x6   :  { %180 = vperm.xlu0 %269, %v177_v15   ;;  %v17_v18 = vld [vmem:[%s369_s0] sm:$0x3]  ;;  %v202_v27 = vsub.s32 %v199_v22, %v201_v23 }
   0x7   :  { %98 = vmatpush1.bf16.msra.mxu0 %v280_v7  ;;  %v84_v16 = vsel %vm82_vm0, %v257_v13, 0  ;;  %v90_v17 = vsel %vm82_vm0, %v259_v14, 0 }
   0x8   :  { %139 = vmatpush1.bf16.msra.mxu1 %v281_v8  ;;  %261 = vmatprep.subr.msk.bf16.mxu0 %vm82_vm0, %v258_v11 }
   0x9   :  { %263 = vmatprep.subr.msk.bf16.mxu1 %vm82_vm0, %v260_v12 }
   0xb   :  { %100 = vmatpush1.bf16.msra.mxu0 %v84_v16 }
   0xc   :  { %141 = vmatpush1.bf16.msra.mxu1 %v90_v17 }
   0xe   :  { %262 = vmatmul.mubr.msk.bf16.vlgmr.msra.gmra.mrb[0].mxu0 %vm78_vm1, %v17_v18 }
   0xf   :  { %264 = vmatmul.mubr.msk.bf16.vlgmr.msra.gmra.mrb[0].mxu1 %vm78_vm1, %v17_v18 }
  0x85   :  { %v181_v24 = vpop.permute.xlu0 %180 }
  0xe1   :  { %v129_v25 = vpop.f32.mrb[0].mxu0 }
  0xe2   :  { %v170_v26 = vpop.f32.mrb[0].mxu1  ;;  %v183_v28 = vadd.f32 %v181_v24, %v129_v25  ;;  %v215_v29 = vsel %vm214_vm2, %v129_v25, 0.0  ;;  %v224_v30 = vmul.f32 %v129_v25, %v129_v25  ;;  %v131_v32 = vpop.f32.mrb[1].mxu0 }
  0xe3   :  { %v185_v31 = vadd.f32 %v181_v24, %v170_v26  ;;  %v172_v33 = vpop.f32.mrb[1].mxu1  ;;  %v218_v34 = vsel %vm214_vm2, %v170_v26, 0.0  ;;  %v226_v35 = vmul.f32 %v170_v26, %v170_v26  ;;  %v184_v36 = vadd.f32 %v181_v24, %v131_v32  ;;  %v133_v38 = vpop.f32.mrb[2].mxu0 }
  0xe4   :  { %v216_v37 = vsel %vm214_vm2, %v131_v32, 0.0  ;;  %v174_v39 = vpop.f32.mrb[2].mxu1  ;;  %v225_v41 = vmul.f32 %v131_v32, %v131_v32  ;;  %v186_v42 = vadd.f32 %v181_v24, %v172_v33  ;;  %v134_v43 = vpop.f32.mrb[3].mxu0  ;;  %v227_v46 = vmul.f32 %v172_v33, %v172_v33 }
  0xe5   :  { %v217_v40 = vadd.f32 %v216_v37, %v215_v29  ;;  %v175_v44 = vpop.f32.mrb[3].mxu1  ;;  %v265_v45 = vpack.c.bf16 %v184_v36, %v183_v28  ;;  %v228_v47 = vsel %vm214_vm2, %v224_v30, 0.0  ;;  %v231_v51 = vsel %vm214_vm2, %v226_v35, 0.0 }
  0xe6   :  { %v266_v48 = vpack.c.bf16 %v186_v42, %v185_v31  ;;  %v229_v50 = vsel %vm214_vm2, %v225_v41, 0.0  ;;  %v220_v53 = vsel %vm214_vm2, %v172_v33, 0.0  ;;  %v233_v59 = vsel %vm214_vm2, %v227_v46, 0.0 }
  0xe7   :  { %v219_v49 = vadd.f32 %v218_v34, %v217_v40  ;;  %v203_v52 = vrot.slane %v265_v45, %v202_v27  ;;  %v230_v54 = vadd.f32 %v229_v50, %v228_v47 }
  0xe8   :  { %v210_v55 = vrot.slane %v266_v48, %v202_v27 }
  0xe9   :  { %v221_v56 = vadd.f32 %v220_v53, %v219_v49  ;;  %v232_v57 = vadd.f32 %v231_v51, %v230_v54 }
  0xea   :  { %v211_v58 = vcombine.low %v203_v52, %v210_v55 }
  0xeb   :  { %222 = vadd.xlane.f32.xlu0 %v221_v56  ;;  %v234_v60 = vadd.f32 %v233_v59, %v232_v57 }
  0xec   :  { %213 = vst [vmem:[%s370_s3] sm:$0xff] %v211_v58 }
  0xed   :  { %235 = vadd.xlane.f32.xlu1 %v234_v60 }
 0x178   :  { %v223_v61 = vpop.xlane.xlu0 %222 }
 0x17a   :  { %v236_v62 = vpop.xlane.xlu1 %235 }
 0x17b   :  { %v238_v63 = vsel %vm237_vm3, %v223_v61, %v236_v62 }
 0x17c   :  { %240 = vst.msk [vmem:[%s371_s4] sm:$0xf] %vm239_vm4, %v238_v63 }

// kernel: resblock_up_forward.7
= control target key start
LH: loop header
LB: loop body
LE: loop exit
PB: predicated region body
PF: predicated region fallthrough
CT: control target
= control target key end

     0   :  { %v291_v0 = vmov 0   ;;  %v292_v2 = vmov 1   ;;  %v293_v3 = vmov 2   ;;  %v294_v4 = vmov 3   ;;  %s663_s1 = inlined_call_operand.vmem [shape: f32[8,4], index: 1, kind: input, shape index: {}]   ;;  %s664_s0 = inlined_call_operand.vmem [shape: bf16[2,8,2048], index: 0, kind: input, shape index: {}]   ;;  %s665_s2 = inlined_call_operand.vmem [shape: f32[8,2048], index: 2, kind: output, shape index: {}]  }
   0x1   :  { %286 = vset.pattern.permute.xlu0 %v291_v0  ;;  %v11_v1 = vld [vmem:[%s663_s1] sm:$0xff]  ;;  %288 = vset.pattern.permute.xlu1 %v292_v2  ;;  %v13_v6 = vld [vmem:[%s664_s0 + $0x8] sm:$0xff]  ;;  %v14_v7 = vld [vmem:[%s664_s0 + $0x10] sm:$0xff] }
   0x2   :  { %38 = vperm.xlu0 %286, %v11_v1   ;;  %58 = vperm.xlu1 %288, %v11_v1   ;;  %v12_v5 = vld [vmem:[%s664_s0] sm:$0xff]  ;;  %v15_v8 = vld [vmem:[%s664_s0 + $0x18] sm:$0xff]  ;;  %v17_v10 = vld [vmem:[%s664_s0 + $0x28] sm:$0xff]  ;;  %v22_v15 = vunpack.c.l.bf16 %v13_v6  ;;  %v23_v16 = vunpack.c.h.bf16 %v13_v6  ;;  %v24_v17 = vunpack.c.l.bf16 %v14_v7  ;;  %v25_v18 = vunpack.c.h.bf16 %v14_v7 }
   0x3   :  { %v16_v9 = vld [vmem:[%s664_s0 + $0x20] sm:$0xff]  ;;  %v18_v11 = vld [vmem:[%s664_s0 + $0x30] sm:$0xff]  ;;  %v19_v12 = vld [vmem:[%s664_s0 + $0x38] sm:$0xff]  ;;  %v20_v13 = vunpack.c.l.bf16 %v12_v5  ;;  %v21_v14 = vunpack.c.h.bf16 %v12_v5  ;;  %v26_v19 = vunpack.c.l.bf16 %v15_v8  ;;  %v27_v20 = vunpack.c.h.bf16 %v15_v8 }
   0x4   :  { %v340_v21 = vld [vmem:[%s664_s0 + $0x40] sm:$0xff]  ;;  %v345_v22 = vld [vmem:[%s664_s0 + $0x48] sm:$0xff]  ;;  %v28_v23 = vunpack.c.l.bf16 %v16_v9  ;;  %v29_v24 = vunpack.c.h.bf16 %v16_v9  ;;  %v30_v25 = vunpack.c.l.bf16 %v17_v10  ;;  %v31_v26 = vunpack.c.h.bf16 %v17_v10  ;;  %v350_v27 = vld [vmem:[%s664_s0 + $0x50] sm:$0xff] }
   0x5   :  { %v355_v28 = vld [vmem:[%s664_s0 + $0x58] sm:$0xff]  ;;  %v32_v29 = vunpack.c.l.bf16 %v18_v11  ;;  %v33_v30 = vunpack.c.h.bf16 %v18_v11  ;;  %v34_v31 = vunpack.c.l.bf16 %v19_v12  ;;  %v35_v32 = vunpack.c.h.bf16 %v19_v12  ;;  %v360_v33 = vld [vmem:[%s664_s0 + $0x60] sm:$0xff]  ;;  %v365_v34 = vld [vmem:[%s664_s0 + $0x68] sm:$0xff] }
   0x6   :  { %287 = vset.pattern.permute.xlu0 %v293_v3  ;;  %289 = vset.pattern.permute.xlu1 %v294_v4  ;;  %v370_v35 = vld [vmem:[%s664_s0 + $0x70] sm:$0xff]  ;;  %v375_v36 = vld [vmem:[%s664_s0 + $0x78] sm:$0xff]  ;;  %v134_v37 = vunpack.c.l.bf16 %v340_v21  ;;  %v135_v38 = vunpack.c.h.bf16 %v340_v21  ;;  %v136_v39 = vunpack.c.l.bf16 %v345_v22  ;;  %v137_v40 = vunpack.c.h.bf16 %v345_v22 }
   0x7   :  { %151 = vperm.xlu0 %287, %v11_v1   ;;  %171 = vperm.xlu1 %289, %v11_v1   ;;  %v138_v41 = vunpack.c.l.bf16 %v350_v27  ;;  %v139_v42 = vunpack.c.h.bf16 %v350_v27  ;;  %v140_v43 = vunpack.c.l.bf16 %v355_v28  ;;  %v141_v44 = vunpack.c.h.bf16 %v355_v28 }
   0x8   :  { %v142_v46 = vunpack.c.l.bf16 %v360_v33  ;;  %v143_v47 = vunpack.c.h.bf16 %v360_v33  ;;  %v144_v48 = vunpack.c.l.bf16 %v365_v34  ;;  %v145_v49 = vunpack.c.h.bf16 %v365_v34 }
   0x9   :  { %v146_v50 = vunpack.c.l.bf16 %v370_v35  ;;  %v147_v51 = vunpack.c.h.bf16 %v370_v35  ;;  %v148_v52 = vunpack.c.l.bf16 %v375_v36  ;;  %v149_v53 = vunpack.c.h.bf16 %v375_v36 }
   0xb   :  { %290 = vset.pattern.permute.xlu0 %v294_v4 }
  0x81   :  { %v39_v45 = vpop.permute.xlu0 %38  ;;  %v59_v62 = vpop.permute.xlu1 %58 }
  0x82   :  { %v41_v54 = vmul.f32 %v39_v45, %v20_v13  ;;  %v42_v55 = vmul.f32 %v39_v45, %v21_v14  ;;  %v43_v56 = vmul.f32 %v39_v45, %v22_v15  ;;  %v44_v57 = vmul.f32 %v39_v45, %v23_v16 }
  0x83   :  { %v45_v58 = vmul.f32 %v39_v45, %v24_v17  ;;  %v46_v59 = vmul.f32 %v39_v45, %v25_v18  ;;  %v47_v60 = vmul.f32 %v39_v45, %v26_v19  ;;  %v48_v61 = vmul.f32 %v39_v45, %v27_v20 }
  0x84   :  { %v49_v63 = vmul.f32 %v39_v45, %v28_v23  ;;  %v50_v0 = vmul.f32 %v39_v45, %v29_v24  ;;  %v51_v1 = vmul.f32 %v39_v45, %v30_v25  ;;  %v52_v2 = vmul.f32 %v39_v45, %v31_v26 }
  0x85   :  { %v53_v3 = vmul.f32 %v39_v45, %v32_v29  ;;  %v54_v4 = vmul.f32 %v39_v45, %v33_v30  ;;  %v55_v5 = vmul.f32 %v39_v45, %v34_v31  ;;  %v56_v6 = vmul.f32 %v39_v45, %v35_v32 }
  0x86   :  { %v393_v7 = vadd.f32 %v59_v62, %v41_v54  ;;  %v395_v8 = vadd.f32 %v59_v62, %v42_v55  ;;  %v397_v9 = vadd.f32 %v59_v62, %v43_v56  ;;  %v399_v10 = vadd.f32 %v59_v62, %v44_v57  ;;  %v152_v15 = vpop.permute.xlu0 %151 }
  0x87   :  { %v401_v11 = vadd.f32 %v59_v62, %v45_v58  ;;  %v403_v12 = vadd.f32 %v59_v62, %v46_v59  ;;  %v405_v13 = vadd.f32 %v59_v62, %v47_v60  ;;  %v407_v14 = vadd.f32 %v59_v62, %v48_v61 }
  0x88   :  { %v409_v16 = vadd.f32 %v59_v62, %v49_v63  ;;  %v411_v17 = vadd.f32 %v59_v62, %v50_v0  ;;  %v413_v18 = vadd.f32 %v59_v62, %v51_v1  ;;  %v415_v19 = vadd.f32 %v59_v62, %v52_v2 }
  0x89   :  { %v417_v20 = vadd.f32 %v59_v62, %v53_v3  ;;  %v419_v21 = vadd.f32 %v59_v62, %v54_v4  ;;  %v421_v22 = vadd.f32 %v59_v62, %v55_v5  ;;  %v423_v23 = vadd.f32 %v59_v62, %v56_v6 }
  0x8a   :  { %v154_v24 = vmul.f32 %v152_v15, %v134_v37  ;;  %v155_v25 = vmul.f32 %v152_v15, %v135_v38  ;;  %v425_v26 = vmul.f32 %v152_v15, %v136_v39  ;;  %v427_v27 = vmul.f32 %v152_v15, %v137_v40  ;;  %v172_v39 = vpop.permute.xlu1 %171 }
  0x8b   :  { %v429_v28 = vmul.f32 %v152_v15, %v138_v41  ;;  %v431_v29 = vmul.f32 %v152_v15, %v139_v42  ;;  %v433_v30 = vmul.f32 %v152_v15, %v140_v43  ;;  %v435_v31 = vmul.f32 %v152_v15, %v141_v44 }
  0x8c   :  { %v437_v32 = vmul.f32 %v152_v15, %v142_v46  ;;  %v439_v33 = vmul.f32 %v152_v15, %v143_v47  ;;  %v441_v34 = vmul.f32 %v152_v15, %v144_v48  ;;  %v443_v35 = vmul.f32 %v152_v15, %v145_v49 }
  0x8d   :  { %v445_v37 = vmul.f32 %v152_v15, %v146_v50  ;;  %v447_v38 = vmul.f32 %v152_v15, %v147_v51  ;;  %vm77_vm0 = vcmp.gt.f32.partialorder %v393_v7, 0.0  ;;  %vm78_vm1 = vcmp.gt.f32.partialorder %v395_v8, 0.0 }
  0x8e   :  { %vm79_vm2 = vcmp.gt.f32.partialorder %v397_v9, 0.0  ;;  %vm80_vm3 = vcmp.gt.f32.partialorder %v399_v10, 0.0  ;;  %vm81_vm4 = vcmp.gt.f32.partialorder %v401_v11, 0.0  ;;  %vm82_vm5 = vcmp.gt.f32.partialorder %v403_v12, 0.0 }
  0x8f   :  { %vm83_vm6 = vcmp.gt.f32.partialorder %v405_v13, 0.0  ;;  %vm84_vm7 = vcmp.gt.f32.partialorder %v407_v14, 0.0  ;;  %vm85_vm8 = vcmp.gt.f32.partialorder %v409_v16, 0.0  ;;  %vm86_vm9 = vcmp.gt.f32.partialorder %v411_v17, 0.0 }
  0x90   :  { %vm87_vm10 = vcmp.gt.f32.partialorder %v413_v18, 0.0  ;;  %vm88_vm11 = vcmp.gt.f32.partialorder %v415_v19, 0.0  ;;  %vm89_vm12 = vcmp.gt.f32.partialorder %v417_v20, 0.0  ;;  %vm90_vm13 = vcmp.gt.f32.partialorder %v419_v21, 0.0 }
  0x91   :  { %v168_v40 = vmul.f32 %v152_v15, %v148_v52  ;;  %v93_v41 = vmul.f32 0.2, %v393_v7  ;;  %v94_v42 = vmul.f32 0.2, %v395_v8  ;;  %v95_v43 = vmul.f32 0.2, %v397_v9 }
  0x92   :  { %v169_v44 = vmul.f32 %v152_v15, %v149_v53  ;;  %v96_v45 = vmul.f32 0.2, %v399_v10  ;;  %v97_v46 = vmul.f32 0.2, %v401_v11  ;;  %v98_v47 = vmul.f32 0.2, %v403_v12 }
  0x93   :  { %v99_v48 = vmul.f32 0.2, %v405_v13  ;;  %v100_v49 = vmul.f32 0.2, %v407_v14  ;;  %v101_v50 = vmul.f32 0.2, %v409_v16  ;;  %v476_v51 = vadd.f32 %v172_v39, %v154_v24 }
  0x94   :  { %v102_v52 = vmul.f32 0.2, %v411_v17  ;;  %v103_v54 = vmul.f32 0.2, %v413_v18  ;;  %v104_v36 = vmul.f32 0.2, %v415_v19  ;;  %v481_v53 = vadd.f32 %v172_v39, %v155_v25 }
  0x95   :  { %v105_v55 = vmul.f32 0.2, %v417_v20  ;;  %v106_v56 = vmul.f32 0.2, %v419_v21  ;;  %v488_v57 = vsel %vm77_vm0, %v393_v7, %v93_v41  ;;  %v493_v58 = vsel %vm78_vm1, %v395_v8, %v94_v42 }
  0x96   :  { %v107_v59 = vmul.f32 0.2, %v421_v22  ;;  %v108_v60 = vmul.f32 0.2, %v423_v23  ;;  %v501_v61 = vsel %vm79_vm2, %v397_v9, %v95_v43  ;;  %v506_v62 = vsel %vm80_vm3, %v399_v10, %v96_v45 }
  0x97   :  { %v512_v63 = vsel %vm81_vm4, %v401_v11, %v97_v46  ;;  %v517_v0 = vsel %vm82_vm5, %v403_v12, %v98_v47  ;;  %v522_v1 = vsel %vm83_vm6, %v405_v13, %v99_v48  ;;  %v527_v2 = vsel %vm84_vm7, %v407_v14, %v100_v49 }
  0x98   :  { %v532_v3 = vsel %vm85_vm8, %v409_v16, %v101_v50  ;;  %v537_v4 = vsel %vm86_vm9, %v411_v17, %v102_v52  ;;  %v542_v5 = vsel %vm87_vm10, %v413_v18, %v103_v54  ;;  %v547_v6 = vsel %vm88_vm11, %v415_v19, %v104_v36 }
  0x99   :  { %v552_v7 = vsel %vm89_vm12, %v417_v20, %v105_v55  ;;  %v557_v8 = vsel %vm90_vm13, %v419_v21, %v106_v56  ;;  %v176_v9 = vadd.f32 %v172_v39, %v425_v26  ;;  %v177_v10 = vadd.f32 %v172_v39, %v427_v27 }
  0x9a   :  { %v178_v11 = vadd.f32 %v172_v39, %v429_v28  ;;  %v179_v12 = vadd.f32 %v172_v39, %v431_v29  ;;  %v180_v13 = vadd.f32 %v172_v39, %v433_v30  ;;  %v181_v14 = vadd.f32 %v172_v39, %v435_v31 }
  0x9b   :  { %v182_v15 = vadd.f32 %v172_v39, %v437_v32  ;;  %v183_v16 = vadd.f32 %v172_v39, %v439_v33  ;;  %v184_v17 = vadd.f32 %v172_v39, %v441_v34  ;;  %v185_v18 = vadd.f32 %v172_v39, %v443_v35 }
  0x9c   :  { %v186_v19 = vadd.f32 %v172_v39, %v445_v37  ;;  %v187_v20 = vadd.f32 %v172_v39, %v447_v38  ;;  %v188_v21 = vadd.f32 %v172_v39, %v168_v40  ;;  %v189_v24 = vadd.f32 %v172_v39, %v169_v44 }
  0x9d   :  { %vm191_vm1 = vcmp.gt.f32.partialorder %v481_v53, 0.0  ;;  %vm192_vm2 = vcmp.gt.f32.partialorder %v176_v9, 0.0  ;;  %vm193_vm3 = vcmp.gt.f32.partialorder %v177_v10, 0.0  ;;  %vm194_vm4 = vcmp.gt.f32.partialorder %v178_v11, 0.0 }
  0x9e   :  { %vm195_vm5 = vcmp.gt.f32.partialorder %v179_v12, 0.0  ;;  %vm196_vm6 = vcmp.gt.f32.partialorder %v180_v13, 0.0  ;;  %vm198_vm8 = vcmp.gt.f32.partialorder %v182_v15, 0.0  ;;  %vm199_vm9 = vcmp.gt.f32.partialorder %v183_v16, 0.0 }
  0x9f   :  { %vm200_vm10 = vcmp.gt.f32.partialorder %v184_v17, 0.0  ;;  %vm201_vm11 = vcmp.gt.f32.partialorder %v185_v18, 0.0  ;;  %vm202_vm12 = vcmp.gt.f32.partialorder %v186_v19, 0.0  ;;  %vm203_vm13 = vcmp.gt.f32.partialorder %v187_v20, 0.0 }
  0xa0   :  { %vm204_vm15 = vcmp.gt.f32.partialorder %v188_v21, 0.0  ;;  %vm666_vm0 = vcmp.gt.f32.partialorder %v421_v22, 0.0  ;;  %v206_v26 = vmul.f32 0.2, %v476_v51  ;;  %v207_v27 = vmul.f32 0.2, %v481_v53 }
  0xa1   :  { %v123_v25 = vsel %vm666_vm0, %v421_v22, %v107_v59  ;;  %v208_v28 = vmul.f32 0.2, %v176_v9  ;;  %vm667_vm7 = vcmp.gt.f32.partialorder %v423_v23, 0.0  ;;  %v209_v30 = vmul.f32 0.2, %v177_v10 }
  0xa2   :  { %v124_v29 = vsel %vm667_vm7, %v423_v23, %v108_v60  ;;  %v210_v31 = vmul.f32 0.2, %v178_v11  ;;  %v211_v32 = vmul.f32 0.2, %v179_v12  ;;  %v212_v33 = vmul.f32 0.2, %v180_v13 }
  0xa3   :  { %v213_v34 = vmul.f32 0.2, %v181_v14  ;;  %v214_v35 = vmul.f32 0.2, %v182_v15  ;;  %vm668_vm14 = vcmp.gt.f32.partialorder %v476_v51, 0.0  ;;  %v223_v40 = vsel %vm191_vm1, %v481_v53, %v207_v27 }
  0xa4   :  { %v222_v37 = vsel %vm668_vm14, %v476_v51, %v206_v26  ;;  %v215_v22 = vmul.f32 0.2, %v183_v16  ;;  %v216_v38 = vmul.f32 0.2, %v184_v17  ;;  %v217_v39 = vmul.f32 0.2, %v185_v18 }
  0xa5   :  { %v218_v41 = vmul.f32 0.2, %v186_v19  ;;  %v219_v42 = vmul.f32 0.2, %v187_v20  ;;  %v220_v23 = vmul.f32 0.2, %v188_v21  ;;  %v224_v43 = vsel %vm192_vm2, %v176_v9, %v208_v28 }
  0xa6   :  { %v221_v44 = vmul.f32 0.2, %v189_v24  ;;  %v225_v45 = vsel %vm193_vm3, %v177_v10, %v209_v30  ;;  %v226_v46 = vsel %vm194_vm4, %v178_v11, %v210_v31  ;;  %v227_v47 = vsel %vm195_vm5, %v179_v12, %v211_v32 }
  0xa7   :  { %v228_v48 = vsel %vm196_vm6, %v180_v13, %v212_v33  ;;  %vm669_vm14 = vcmp.gt.f32.partialorder %v181_v14, 0.0  ;;  %v230_v50 = vsel %vm198_vm8, %v182_v15, %v214_v35  ;;  %v231_v51 = vsel %vm199_vm9, %v183_v16, %v215_v22 }
  0xa8   :  { %v229_v49 = vsel %vm669_vm14, %v181_v14, %v213_v34  ;;  %v232_v52 = vsel %vm200_vm10, %v184_v17, %v216_v38  ;;  %v233_v54 = vsel %vm201_vm11, %v185_v18, %v217_v39  ;;  %v234_v36 = vsel %vm202_vm12, %v186_v19, %v218_v41 }
  0xa9   :  { %v235_v53 = vsel %vm203_vm13, %v187_v20, %v219_v42  ;;  %v236_v55 = vsel %vm204_vm15, %v188_v21, %v220_v23  ;;  %vm670_vm0 = vcmp.gt.f32.partialorder %v189_v24, 0.0  ;;  %v238_v59 = vadd.f32 %v222_v37, %v488_v57 }
  0xaa   :  { %v237_v56 = vsel %vm670_vm0, %v189_v24, %v221_v44  ;;  %v239_v60 = vadd.f32 %v223_v40, %v493_v58  ;;  %v240_v9 = vadd.f32 %v224_v43, %v501_v61  ;;  %v241_v10 = vadd.f32 %v225_v45, %v506_v62 }
  0xab   :  { %v242_v11 = vadd.f32 %v226_v46, %v512_v63  ;;  %v243_v12 = vadd.f32 %v227_v47, %v517_v0  ;;  %v244_v13 = vadd.f32 %v228_v48, %v522_v1  ;;  %v245_v14 = vadd.f32 %v229_v49, %v527_v2  ;;  %254 = vst [vmem:[%s665_s2] sm:$0xff] %v238_v59 }
  0xac   :  { %v246_v15 = vadd.f32 %v230_v50, %v532_v3  ;;  %v247_v16 = vadd.f32 %v231_v51, %v537_v4  ;;  %255 = vst [vmem:[%s665_s2 + $0x8] sm:$0xff] %v239_v60  ;;  %v248_v57 = vadd.f32 %v232_v52, %v542_v5  ;;  %v249_v58 = vadd.f32 %v233_v54, %v547_v6 }
  0xad   :  { %v250_v61 = vadd.f32 %v234_v36, %v552_v7  ;;  %v251_v62 = vadd.f32 %v235_v53, %v557_v8  ;;  %256 = vst [vmem:[%s665_s2 + $0x10] sm:$0xff] %v240_v9  ;;  %257 = vst [vmem:[%s665_s2 + $0x18] sm:$0xff] %v241_v10  ;;  %v252_v63 = vadd.f32 %v236_v55, %v123_v25 }
  0xae   :  { %258 = vst [vmem:[%s665_s2 + $0x20] sm:$0xff] %v242_v11  ;;  %259 = vst [vmem:[%s665_s2 + $0x28] sm:$0xff] %v243_v12  ;;  %v253_v0 = vadd.f32 %v237_v56, %v124_v29 }
  0xaf   :  { %260 = vst [vmem:[%s665_s2 + $0x30] sm:$0xff] %v244_v13  ;;  %261 = vst [vmem:[%s665_s2 + $0x38] sm:$0xff] %v245_v14 }
  0xb0   :  { %262 = vst [vmem:[%s665_s2 + $0x40] sm:$0xff] %v246_v15  ;;  %263 = vst [vmem:[%s665_s2 + $0x48] sm:$0xff] %v247_v16 }
  0xb1   :  { %264 = vst [vmem:[%s665_s2 + $0x50] sm:$0xff] %v248_v57  ;;  %265 = vst [vmem:[%s665_s2 + $0x58] sm:$0xff] %v249_v58 }
  0xb2   :  { %266 = vst [vmem:[%s665_s2 + $0x60] sm:$0xff] %v250_v61  ;;  %267 = vst [vmem:[%s665_s2 + $0x68] sm:$0xff] %v251_v62 }
  0xb3   :  { %268 = vst [vmem:[%s665_s2 + $0x70] sm:$0xff] %v252_v63  ;;  %269 = vst [vmem:[%s665_s2 + $0x78] sm:$0xff] %v253_v0 }

// kernel: resblock_up_forward.6
= control target key start
LH: loop header
LB: loop body
LE: loop exit
PB: predicated region body
PF: predicated region fallthrough
CT: control target
= control target key end

     0   :  { %s1401_s15 = smov 0   ;;  %s1403_s16 = smov 0   ;;  %s1567_s0 = inlined_call_operand.vmem [shape: bf16[2,8,36], index: 0, kind: input, shape index: {}]   ;;  %s1568_s1 = inlined_call_operand.vmem [shape: bf16[2,36,2048], index: 1, kind: input, shape index: {}]   ;;  %s1569_s2 = inlined_call_operand.vmem [shape: f32[2,8,1], index: 2, kind: input, shape index: {}]   ;;  %s1570_s3 = inlined_call_operand.vmem [shape: bf16[2,8,2048], index: 3, kind: output, shape index: {0}]   ;;  %s1571_s4 = inlined_call_operand.vmem [shape: f32[2,1,8,2], index: 4, kind: output, shape index: {1}]  }
   0x1   :  { %s1405_s17 = smov 0  }
   0x2 LB: > { %s27_s18 = sadd.s32 1, %s1369_s16  ;;  %p1217_p0 = scmp.ge.s32.totalorder %s1373_s17, 1  ;;  %s1373_s17 = sphi %s1405_s17, %s15_s17   ;;  %s1369_s16 = sphi %s1403_s16, %s1573_s16   ;;  %s1365_s15 = sphi %s1401_s15, %s1572_s15  }
   0x3   : > { %p29_p1 = scmp.ge.s32.totalorder %s27_s18, 2  ;;  %p206_p2 = scmp.lt.s32.totalorder %s1373_s17, 3 }
   0x5   : > { %s1575_s18 = smov (%p29_p1, %s27_s18), 0  ;;  %p207_p3 = pnand %p1217_p0, %p206_p2 }
   0x6   : > { %p255_p4 = scmp.lt.s32.totalorder (!%p207_p3), %s1365_s15, 1  ;;  %v1375_v0 = vmov (!%p207_p3), 0   ;;  %vm536_vm0 = vcmask (!%p207_p3), 1041408   ;;  %vm532_vm1 = vcmask (!%p207_p3), 293888   ;;  %vm1057_vm2 = vcmask (!%p207_p3), 7168  }
   0x7   : > { %210 = sbr.rel (%p207_p3) target bundleno = 438 (0x1b6), region = 32  ;;  %617 = vmatprep.mubr.bf16.mxu0 (!%p207_p3), %v1375_v0  ;;  %658 = vmatprep.mubr.bf16.mxu1 (!%p207_p3), %v1375_v0  ;;  %vm1059_vm3 = vcmask (!%p207_p3), 15360  }
   0x8   : > { %1333 = vset.pattern.permute.xlu1 (!%p207_p3), %v1375_v0  ;;  %1334 = vset.pattern.permute.xlu0 (!%p207_p3), %v1375_v0 }
   0xe   : > { %s1577_s15 = smov (!%p255_p4, %s1365_s15), 1 }
   0xf   : > { %s1307_s19 = smul.u32 320, %s1577_s15  ;;  %s1218_s23 = sshll.u32 %s1577_s15, 2 }
  0x10   : > { %s1220_s24 = sshll.u32 %s1577_s15, 3  ;;  %s258_s27 = scalar_lea.vmem %s1567_s0, %s1218_s23 }
  0x11   : > { %s1429_s22 = scalar_lea.vmem %s1568_s1, %s1307_s19  ;;  %s272_s30 = scalar_lea.vmem %s1569_s2, %s1220_s24  ;;  %v1463_v35 = vld [vmem:[%s258_s27] sm:$0xf] }
  0x12   : > { %v292_v1 = vld [vmem:[%s1429_s22] sm:$0xff]  ;;  %v293_v3 = vld [vmem:[%s1429_s22 + $0x8] sm:$0xff]  ;;  %v294_v23 = vld [vmem:[%s1429_s22 + $0x10] sm:$0xff]  ;;  %s1298_s5 = sshll.u32 %s1577_s15, 6  ;;  %s289_s11 = scalar_lea.vmem %s1571_s4, %s1220_s24 }
  0x13   : > { %v300_v2 = vld [vmem:[%s1429_s22 + $0x40] sm:$0xff]  ;;  %v301_v6 = vld [vmem:[%s1429_s22 + $0x48] sm:$0xff]  ;;  %v302_v24 = vld [vmem:[%s1429_s22 + $0x50] sm:$0xff]  ;;  %s1530_s8 = scalar_lea.vmem %s1570_s3, %s1298_s5 }
  0x14   : > { %v1225_v4 = vcombine.high %v292_v1, %v300_v2  ;;  %v1224_v5 = vcombine.low %v292_v1, %v300_v2  ;;  %v308_v7 = vld [vmem:[%s1429_s22 + $0x80] sm:$0xff]  ;;  %v1227_v9 = vcombine.high %v293_v3, %v301_v6  ;;  %v1226_v10 = vcombine.low %v293_v3, %v301_v6  ;;  %v309_v12 = vld [vmem:[%s1429_s22 + $0x88] sm:$0xff]  ;;  %v295_v25 = vld [vmem:[%s1429_s22 + $0x18] sm:$0xff] }
  0x15   : > { %v316_v8 = vld [vmem:[%s1429_s22 + $0xc0] sm:$0xff]  ;;  %v317_v13 = vld [vmem:[%s1429_s22 + $0xc8] sm:$0xff]  ;;  %v303_v26 = vld [vmem:[%s1429_s22 + $0x58] sm:$0xff]  ;;  %v1229_v28 = vcombine.high %v294_v23, %v302_v24  ;;  %v1228_v36 = vcombine.low %v294_v23, %v302_v24 }
  0x16   : > { %v1241_v11 = vcombine.high %v308_v7, %v316_v8  ;;  %v324_v14 = vld [vmem:[%s1429_s22 + $0x100] sm:$0x33]  ;;  %585 = vmatprep.subr.bf16.mxu0 %v1225_v4  ;;  %v1243_v15 = vcombine.high %v309_v12, %v317_v13  ;;  %v325_v16 = vld [vmem:[%s1429_s22 + $0x108] sm:$0x33]  ;;  %626 = vmatprep.subr.bf16.mxu1 %v1227_v9  ;;  %v1240_v17 = vcombine.low %v308_v7, %v316_v8  ;;  %v310_v31 = vld [vmem:[%s1429_s22 + $0x90] sm:$0xff] }
  0x17   : > { %586 = vmatpush1.bf16.msra.mxu0 %v1224_v5  ;;  %627 = vmatpush1.bf16.msra.mxu1 %v1226_v10  ;;  %v1242_v18 = vcombine.low %v309_v12, %v317_v13  ;;  %v1257_v19 = vcombine.high %v324_v14, %v324_v14  ;;  %v1256_v20 = vcombine.low %v324_v14, %v324_v14  ;;  %v318_v32 = vld [vmem:[%s1429_s22 + $0xd0] sm:$0xff]  ;;  %v311_v33 = vld [vmem:[%s1429_s22 + $0x98] sm:$0xff]  ;;  %v913_v39 = vld [vmem:[%s272_s30] sm:$0xff] }
  0x18   : > { %587 = vmatprep.subr.bf16.mxu0 %v1241_v11  ;;  %628 = vmatprep.subr.bf16.mxu1 %v1243_v15  ;;  %v1259_v21 = vcombine.high %v325_v16, %v325_v16  ;;  %v1258_v22 = vcombine.low %v325_v16, %v325_v16  ;;  %v1231_v30 = vcombine.high %v295_v25, %v303_v26  ;;  %v319_v34 = vld [vmem:[%s1429_s22 + $0xd8] sm:$0xff]  ;;  %v326_v41 = vld [vmem:[%s1429_s22 + $0x110] sm:$0x33]  ;;  %v296_v49 = vld [vmem:[%s1429_s22 + $0x20] sm:$0xff] }
  0x19   : > { %v538_v27 = vsel %vm536_vm0, %v1256_v20, 0  ;;  %v1230_v37 = vcombine.low %v295_v25, %v303_v26  ;;  %v1245_v38 = vcombine.high %v310_v31, %v318_v32  ;;  %v1247_v40 = vcombine.high %v311_v33, %v319_v34  ;;  %v327_v42 = vld [vmem:[%s1429_s22 + $0x118] sm:$0x33]  ;;  %916 = vperm.xlu1 %1333, %v913_v39   ;;  %v304_v50 = vld [vmem:[%s1429_s22 + $0x60] sm:$0xff]  ;;  %v297_v51 = vld [vmem:[%s1429_s22 + $0x28] sm:$0xff] }
  0x1a   : > { %v544_v29 = vsel %vm536_vm0, %v1258_v22, 0  ;;  %v1244_v43 = vcombine.low %v310_v31, %v318_v32  ;;  %v1246_v44 = vcombine.low %v311_v33, %v319_v34  ;;  %v1261_v45 = vcombine.high %v326_v41, %v326_v41  ;;  %v305_v52 = vld [vmem:[%s1429_s22 + $0x68] sm:$0xff]  ;;  %v312_v57 = vld [vmem:[%s1429_s22 + $0xa0] sm:$0xff]  ;;  %v298_v10 = vld [vmem:[%s1429_s22 + $0x30] sm:$0xff] }
  0x1b   : > { %588 = vmatpush1.bf16.msra.mxu0 %v1240_v17  ;;  %629 = vmatpush1.bf16.msra.mxu1 %v1242_v18  ;;  %v1260_v46 = vcombine.low %v326_v41, %v326_v41  ;;  %v1263_v47 = vcombine.high %v327_v42, %v327_v42  ;;  %v1262_v48 = vcombine.low %v327_v42, %v327_v42  ;;  %v320_v58 = vld [vmem:[%s1429_s22 + $0xe0] sm:$0xff]  ;;  %v313_v59 = vld [vmem:[%s1429_s22 + $0xa8] sm:$0xff]  ;;  %v306_v11 = vld [vmem:[%s1429_s22 + $0x70] sm:$0xff] }
  0x1c   : > { %1272 = vmatprep.subr.msk.bf16.mxu0 %vm536_vm0, %v1257_v19  ;;  %1274 = vmatprep.subr.msk.bf16.mxu1 %vm536_vm0, %v1259_v21  ;;  %v1233_v54 = vcombine.high %v296_v49, %v304_v50  ;;  %v1235_v56 = vcombine.high %v297_v51, %v305_v52  ;;  %v321_v60 = vld [vmem:[%s1429_s22 + $0xe8] sm:$0xff]  ;;  %v1232_v61 = vcombine.low %v296_v49, %v304_v50  ;;  %v328_v2 = vld [vmem:[%s1429_s22 + $0x120] sm:$0x33]  ;;  %v299_v12 = vld [vmem:[%s1429_s22 + $0x38] sm:$0xff] }
  0x1d   : > { %v550_v53 = vsel %vm536_vm0, %v1260_v46, 0  ;;  %v556_v55 = vsel %vm536_vm0, %v1262_v48, 0  ;;  %v1234_v62 = vcombine.low %v297_v51, %v305_v52  ;;  %v1249_v63 = vcombine.high %v312_v57, %v320_v58  ;;  %v329_v3 = vld [vmem:[%s1429_s22 + $0x128] sm:$0x33]  ;;  %v307_v13 = vld [vmem:[%s1429_s22 + $0x78] sm:$0xff]  ;;  %v314_v18 = vld [vmem:[%s1429_s22 + $0xb0] sm:$0xff] }
  0x1e   : > { %v1251_v1 = vcombine.high %v313_v59, %v321_v60  ;;  %v1248_v4 = vcombine.low %v312_v57, %v320_v58  ;;  %v1250_v5 = vcombine.low %v313_v59, %v321_v60  ;;  %v1265_v6 = vcombine.high %v328_v2, %v328_v2  ;;  %v322_v19 = vld [vmem:[%s1429_s22 + $0xf0] sm:$0xff]  ;;  %v315_v20 = vld [vmem:[%s1429_s22 + $0xb8] sm:$0xff] }
  0x1f   : > { %590 = vmatpush1.bf16.msra.mxu0 %v538_v27  ;;  %631 = vmatpush1.bf16.msra.mxu1 %v544_v29  ;;  %v1264_v7 = vcombine.low %v328_v2, %v328_v2  ;;  %v1267_v8 = vcombine.high %v329_v3, %v329_v3  ;;  %v1266_v9 = vcombine.low %v329_v3, %v329_v3  ;;  %v323_v21 = vld [vmem:[%s1429_s22 + $0xf8] sm:$0xff]  ;;  %v330_v26 = vld [vmem:[%s1429_s22 + $0x130] sm:$0x33] }
  0x20   : > { %667 = vmatprep.subr.bf16.mxu0 %v1229_v28  ;;  %708 = vmatprep.subr.bf16.mxu1 %v1231_v30  ;;  %v1237_v15 = vcombine.high %v298_v10, %v306_v11  ;;  %v1239_v17 = vcombine.high %v299_v12, %v307_v13  ;;  %v1236_v22 = vcombine.low %v298_v10, %v306_v11  ;;  %v331_v27 = vld [vmem:[%s1429_s22 + $0x138] sm:$0x33] }
  0x21   : > { %v562_v14 = vsel %vm536_vm0, %v1264_v7, 0  ;;  %v568_v16 = vsel %vm536_vm0, %v1266_v9, 0  ;;  %v1238_v23 = vcombine.low %v299_v12, %v307_v13  ;;  %v1253_v24 = vcombine.high %v314_v18, %v322_v19 }
  0x22   : > { %1273 = vmatmul.mubr.msk.bf16.vlgmr.msra.gmra.mrb[0].mxu0 %vm532_vm1, %v1463_v35  ;;  %1275 = vmatmul.mubr.msk.bf16.vlgmr.msra.gmra.mrb[0].mxu1 %vm532_vm1, %v1463_v35  ;;  %v1255_v25 = vcombine.high %v315_v20, %v323_v21  ;;  %v1252_v28 = vcombine.low %v314_v18, %v322_v19  ;;  %v1254_v29 = vcombine.low %v315_v20, %v323_v21 }
  0x23   : > { %668 = vmatpush1.bf16.msra.mxu0 %v1228_v36  ;;  %709 = vmatpush1.bf16.msra.mxu1 %v1230_v37  ;;  %v1269_v30 = vcombine.high %v330_v26, %v330_v26  ;;  %v1268_v31 = vcombine.low %v330_v26, %v330_v26  ;;  %v1271_v32 = vcombine.high %v331_v27, %v331_v27 }
  0x24   : > { %669 = vmatprep.subr.bf16.mxu0 %v1245_v38  ;;  %710 = vmatprep.subr.bf16.mxu1 %v1247_v40  ;;  %v1270_v33 = vcombine.low %v331_v27, %v331_v27 }
  0x25   : > { %699 = vmatprep.mubr.bf16.mxu0 %v1375_v0  ;;  %740 = vmatprep.mubr.bf16.mxu1 %v1375_v0  ;;  %v574_v34 = vsel %vm536_vm0, %v1268_v31, 0 }
  0x26   : > { %v580_v36 = vsel %vm536_vm0, %v1270_v33, 0 }
  0x27   : > { %670 = vmatpush1.bf16.msra.mxu0 %v1244_v43  ;;  %711 = vmatpush1.bf16.msra.mxu1 %v1246_v44 }
  0x28   : > { %1276 = vmatprep.subr.msk.bf16.mxu0 %vm536_vm0, %v1261_v45  ;;  %1278 = vmatprep.subr.msk.bf16.mxu1 %vm536_vm0, %v1263_v47 }
  0x2b   : > { %672 = vmatpush1.bf16.msra.mxu0 %v550_v53  ;;  %713 = vmatpush1.bf16.msra.mxu1 %v556_v55 }
  0x2c   : > { %749 = vmatprep.subr.bf16.mxu0 %v1233_v54  ;;  %790 = vmatprep.subr.bf16.mxu1 %v1235_v56 }
  0x2e   : > { %1277 = vmatmul.mubr.msk.bf16.vlgmr.msra.gmra.mrb[4].mxu0 %vm532_vm1, %v1463_v35  ;;  %1279 = vmatmul.mubr.msk.bf16.vlgmr.msra.gmra.mrb[4].mxu1 %vm532_vm1, %v1463_v35 }
  0x2f   : > { %750 = vmatpush1.bf16.msra.mxu0 %v1232_v61  ;;  %791 = vmatpush1.bf16.msra.mxu1 %v1234_v62 }
  0x30   : > { %751 = vmatprep.subr.bf16.mxu0 %v1249_v63  ;;  %792 = vmatprep.subr.bf16.mxu1 %v1251_v1 }
  0x31   : > { %781 = vmatprep.mubr.bf16.mxu0 %v1375_v0  ;;  %822 = vmatprep.mubr.bf16.mxu1 %v1375_v0 }
  0x33   : > { %752 = vmatpush1.bf16.msra.mxu0 %v1248_v4  ;;  %793 = vmatpush1.bf16.msra.mxu1 %v1250_v5 }
  0x34   : > { %1280 = vmatprep.subr.msk.bf16.mxu0 %vm536_vm0, %v1265_v6  ;;  %1282 = vmatprep.subr.msk.bf16.mxu1 %vm536_vm0, %v1267_v8 }
  0x37   : > { %754 = vmatpush1.bf16.msra.mxu0 %v562_v14  ;;  %795 = vmatpush1.bf16.msra.mxu1 %v568_v16 }
  0x38   : > { %831 = vmatprep.subr.bf16.mxu0 %v1237_v15  ;;  %872 = vmatprep.subr.bf16.mxu1 %v1239_v17 }
  0x3a   : > { %1281 = vmatmul.mubr.msk.bf16.vlgmr.msra.gmra.mrb[8].mxu0 %vm532_vm1, %v1463_v35  ;;  %1283 = vmatmul.mubr.msk.bf16.vlgmr.msra.gmra.mrb[8].mxu1 %vm532_vm1, %v1463_v35 }
  0x3b   : > { %832 = vmatpush1.bf16.msra.mxu0 %v1236_v22  ;;  %873 = vmatpush1.bf16.msra.mxu1 %v1238_v23 }
  0x3c   : > { %833 = vmatprep.subr.bf16.mxu0 %v1253_v24  ;;  %874 = vmatprep.subr.bf16.mxu1 %v1255_v25 }
  0x3d   : > { %863 = vmatprep.mubr.bf16.mxu0 %v1375_v0  ;;  %904 = vmatprep.mubr.bf16.mxu1 %v1375_v0 }
  0x3f   : > { %834 = vmatpush1.bf16.msra.mxu0 %v1252_v28  ;;  %875 = vmatpush1.bf16.msra.mxu1 %v1254_v29 }
  0x40   : > { %1284 = vmatprep.subr.msk.bf16.mxu0 %vm536_vm0, %v1269_v30  ;;  %1286 = vmatprep.subr.msk.bf16.mxu1 %vm536_vm0, %v1271_v32 }
  0x43   : > { %836 = vmatpush1.bf16.msra.mxu0 %v574_v34  ;;  %877 = vmatpush1.bf16.msra.mxu1 %v580_v36 }
  0x46   : > { %1285 = vmatmul.mubr.msk.bf16.vlgmr.msra.gmra.mrb[12].mxu0 %vm532_vm1, %v1463_v35  ;;  %1287 = vmatmul.mubr.msk.bf16.vlgmr.msra.gmra.mrb[12].mxu1 %vm532_vm1, %v1463_v35 }
  0x98   : > { %v1521_v37 = vpop.permute.xlu1 %916 }
  0xf5   : > { %v619_v0 = vpop.f32.mrb[0].mxu0  ;;  %v660_v41 = vpop.f32.mrb[0].mxu1 }
  0xf6   : > { %v1024_v38 = vmul.f32 %v619_v0, %v619_v0  ;;  %v621_v39 = vpop.f32.mrb[1].mxu0  ;;  %v919_v40 = vadd.f32 %v1521_v37, %v619_v0  ;;  %v921_v46 = vadd.f32 %v1521_v37, %v660_v41  ;;  %v662_v47 = vpop.f32.mrb[1].mxu1  ;;  %v1026_v35 = vmul.f32 %v660_v41, %v660_v41 }
  0xf7   : > { %v920_v42 = vadd.f32 %v1521_v37, %v621_v39  ;;  %v1007_v43 = vadd.f32 %v621_v39, %v619_v0  ;;  %v1025_v44 = vmul.f32 %v621_v39, %v621_v39  ;;  %v623_v45 = vpop.f32.mrb[2].mxu0  ;;  %v922_v49 = vadd.f32 %v1521_v37, %v662_v47  ;;  %v664_v50 = vpop.f32.mrb[2].mxu1 }
  0xf8   : > { %v624_v48 = vpop.f32.mrb[3].mxu0  ;;  %v1027_v54 = vmul.f32 %v662_v47, %v662_v47  ;;  %v665_v55 = vpop.f32.mrb[3].mxu1 }
  0xf9   : > { %v1299_v51 = vpack.c.bf16 %v920_v42, %v919_v40  ;;  %v1040_v52 = vadd.f32 %v1025_v44, %v1024_v38  ;;  %v1008_v53 = vadd.f32 %v1007_v43, %v660_v41  ;;  %v1300_v56 = vpack.c.bf16 %v922_v49, %v921_v46 }
  0xfb   : > { %999 = vst [vmem:[%s1530_s8] sm:$0xff] %v1299_v51  ;;  %v1041_v57 = vadd.f32 %v1040_v52, %v1026_v35  ;;  %v1009_v58 = vadd.f32 %v1008_v53, %v662_v47  ;;  %1000 = vst [vmem:[%s1530_s8 + $0x8] sm:$0xff] %v1300_v56 }
  0xfd   : > { %v1042_v59 = vadd.f32 %v1041_v57, %v1027_v54 }
 0x101   : > { %v701_v60 = vpop.f32.mrb[4].mxu0  ;;  %v742_v2 = vpop.f32.mrb[4].mxu1 }
 0x102   : > { %v923_v61 = vadd.f32 %v1521_v37, %v701_v60  ;;  %v1010_v62 = vadd.f32 %v1009_v58, %v701_v60  ;;  %v1028_v63 = vmul.f32 %v701_v60, %v701_v60  ;;  %v703_v1 = vpop.f32.mrb[5].mxu0  ;;  %v925_v6 = vadd.f32 %v1521_v37, %v742_v2  ;;  %v744_v7 = vpop.f32.mrb[5].mxu1 }
 0x103   : > { %v924_v3 = vadd.f32 %v1521_v37, %v703_v1  ;;  %v1029_v4 = vmul.f32 %v703_v1, %v703_v1  ;;  %v705_v5 = vpop.f32.mrb[6].mxu0  ;;  %v1030_v10 = vmul.f32 %v742_v2, %v742_v2  ;;  %v926_v12 = vadd.f32 %v1521_v37, %v744_v7  ;;  %v746_v13 = vpop.f32.mrb[6].mxu1 }
 0x104   : > { %v1043_v8 = vadd.f32 %v1042_v59, %v1028_v63  ;;  %v1011_v9 = vadd.f32 %v1010_v62, %v703_v1  ;;  %v706_v11 = vpop.f32.mrb[7].mxu0  ;;  %v747_v15 = vpop.f32.mrb[7].mxu1  ;;  %v1031_v19 = vmul.f32 %v744_v7, %v744_v7 }
 0x105   : > { %v1301_v14 = vpack.c.bf16 %v924_v3, %v923_v61  ;;  %v1302_v18 = vpack.c.bf16 %v926_v12, %v925_v6 }
 0x106   : > { %v1044_v16 = vadd.f32 %v1043_v8, %v1029_v4  ;;  %v1012_v17 = vadd.f32 %v1011_v9, %v742_v2 }
 0x107   : > { %1001 = vst [vmem:[%s1530_s8 + $0x10] sm:$0xff] %v1301_v14  ;;  %1002 = vst [vmem:[%s1530_s8 + $0x18] sm:$0xff] %v1302_v18 }
 0x108   : > { %v1045_v20 = vadd.f32 %v1044_v16, %v1030_v10  ;;  %v1013_v21 = vadd.f32 %v1012_v17, %v744_v7 }
 0x10a   : > { %v1046_v22 = vadd.f32 %v1045_v20, %v1031_v19 }
 0x10d   : > { %v783_v23 = vpop.f32.mrb[8].mxu0  ;;  %v824_v28 = vpop.f32.mrb[8].mxu1 }
 0x10e   : > { %v927_v24 = vadd.f32 %v1521_v37, %v783_v23  ;;  %v1014_v25 = vadd.f32 %v1013_v21, %v783_v23  ;;  %v1032_v26 = vmul.f32 %v783_v23, %v783_v23  ;;  %v785_v27 = vpop.f32.mrb[9].mxu0  ;;  %v929_v32 = vadd.f32 %v1521_v37, %v824_v28  ;;  %v826_v33 = vpop.f32.mrb[9].mxu1 }
 0x10f   : > { %v928_v29 = vadd.f32 %v1521_v37, %v785_v27  ;;  %v1033_v30 = vmul.f32 %v785_v27, %v785_v27  ;;  %v787_v31 = vpop.f32.mrb[10].mxu0  ;;  %v1034_v0 = vmul.f32 %v824_v28, %v824_v28  ;;  %v930_v39 = vadd.f32 %v1521_v37, %v826_v33  ;;  %v828_v40 = vpop.f32.mrb[10].mxu1 }
 0x110   : > { %v1047_v34 = vadd.f32 %v1046_v22, %v1032_v26  ;;  %v1015_v36 = vadd.f32 %v1014_v25, %v785_v27  ;;  %v788_v38 = vpop.f32.mrb[11].mxu0  ;;  %v829_v42 = vpop.f32.mrb[11].mxu1  ;;  %v1035_v46 = vmul.f32 %v826_v33, %v826_v33 }
 0x111   : > { %v1303_v41 = vpack.c.bf16 %v928_v29, %v927_v24  ;;  %v1304_v45 = vpack.c.bf16 %v930_v39, %v929_v32 }
 0x112   : > { %v1048_v43 = vadd.f32 %v1047_v34, %v1033_v30  ;;  %v1016_v44 = vadd.f32 %v1015_v36, %v824_v28 }
 0x113   : > { %1003 = vst [vmem:[%s1530_s8 + $0x20] sm:$0xff] %v1303_v41  ;;  %1004 = vst [vmem:[%s1530_s8 + $0x28] sm:$0xff] %v1304_v45 }
 0x114   : > { %v1049_v47 = vadd.f32 %v1048_v43, %v1034_v0  ;;  %v1017_v35 = vadd.f32 %v1016_v44, %v826_v33 }
 0x116   : > { %v1050_v48 = vadd.f32 %v1049_v47, %v1035_v46 }
 0x119   : > { %v865_v49 = vpop.f32.mrb[12].mxu0  ;;  %v906_v54 = vpop.f32.mrb[12].mxu1 }
 0x11a   : > { %v931_v50 = vadd.f32 %v1521_v37, %v865_v49  ;;  %v1018_v51 = vadd.f32 %v1017_v35, %v865_v49  ;;  %v1036_v52 = vmul.f32 %v865_v49, %v865_v49  ;;  %v867_v53 = vpop.f32.mrb[13].mxu0  ;;  %v933_v57 = vadd.f32 %v1521_v37, %v906_v54  ;;  %v908_v59 = vpop.f32.mrb[13].mxu1 }
 0x11b   : > { %v932_v55 = vadd.f32 %v1521_v37, %v867_v53  ;;  %v1037_v56 = vmul.f32 %v867_v53, %v867_v53  ;;  %v869_v58 = vpop.f32.mrb[14].mxu0  ;;  %v1038_v62 = vmul.f32 %v906_v54, %v906_v54  ;;  %v934_v63 = vadd.f32 %v1521_v37, %v908_v59  ;;  %v910_v2 = vpop.f32.mrb[14].mxu1 }
 0x11c   : > { %v1051_v60 = vadd.f32 %v1050_v48, %v1036_v52  ;;  %v1019_v61 = vadd.f32 %v1018_v51, %v867_v53  ;;  %v870_v1 = vpop.f32.mrb[15].mxu0  ;;  %v911_v4 = vpop.f32.mrb[15].mxu1  ;;  %v1039_v9 = vmul.f32 %v908_v59, %v908_v59 }
 0x11d   : > { %v1305_v3 = vpack.c.bf16 %v932_v55, %v931_v50  ;;  %v1306_v5 = vpack.c.bf16 %v934_v63, %v933_v57 }
 0x11e   : > { %v1020_v6 = vadd.f32 %v1019_v61, %v906_v54  ;;  %v1052_v7 = vadd.f32 %v1051_v60, %v1037_v56 }
 0x11f   : > { %1005 = vst [vmem:[%s1530_s8 + $0x30] sm:$0xff] %v1305_v3  ;;  %1006 = vst [vmem:[%s1530_s8 + $0x38] sm:$0xff] %v1306_v5 }
 0x120   : > { %v1021_v8 = vadd.f32 %v1020_v6, %v908_v59  ;;  %v1053_v10 = vadd.f32 %v1052_v7, %v1038_v62 }
 0x122   : > { %1022 = vadd.xlane.f32.xlu0 %v1021_v8  ;;  %v1054_v11 = vadd.f32 %v1053_v10, %v1039_v9 }
 0x126   : > { %1055 = vadd.xlane.f32.xlu0 %v1054_v11 }
 0x1af   : > { %v1023_v12 = vpop.xlane.xlu0 %1022 }
 0x1b3   : > { %v1056_v37 = vpop.xlane.xlu0 %1055 }
 0x1b4   : > { %v1058_v13 = vsel %vm1057_vm2, %v1023_v12, %v1056_v37 }
 0x1b5   : > { %1060 = vst.msk [vmem:[%s289_s11] sm:$0xff] %vm1059_vm3, %v1058_v13 }
 0x1b6 PF: > { %s15_s17 = sadd.s32 1, %s1373_s17   ;;  %s1572_s15 = smov %s1369_s16 }
 0x1b7   : > { %p12_p5 = scmp.ge.s32.totalorder %s15_s17, 4   ;;  %s1573_s16 = smov %s1575_s18 }
 0x1b9   :  { %14 = sbr.rel (!%p12_p5) target bundleno = 2 (0x2), region = 80 }

</bundles_post_ra>
